<compile_context>
chip_gen: v7x
topology: tpu7x:2x2x1
jax: 0.10.0
libtpu: 0.0.40
codegen_flags: <defaults>
</compile_context>

<pallas_src>
import functools

import numpy as np
import jax
import jax.numpy as jnp
from jax.experimental import pallas as pl
from jax.experimental.pallas import tpu as pltpu


# ----------------------------------------------------------------------------
# Kernel 1: fused conv stack (one grid step per image stream)
# ----------------------------------------------------------------------------
def _conv_stack_kernel(p1_ref, w1_ref, b1_ref, *refs):
    pool_refs = refs[0:4]     # maxpool window gathers           (RP, R1) x4
    s2_refs = refs[4:8]       # conv2 im2col tap gathers         (R2, RP) x4
    w2_refs = refs[8:12]      # conv2 per-tap weight chunks      (16, 32) x4
    b2_ref = refs[12]
    s3_refs = refs[13:17]     # conv3 im2col tap gathers         (R3, R2) x4
    w3_refs = refs[17:21]     # conv3 per-tap weight chunks      (32, 64) x4
    b3_ref = refs[21]
    o_ref = refs[22]

    def dot(a, b):
        return jnp.dot(a, b, preferred_element_type=jnp.float32)

    # conv1 (2x2, 3->16) + ReLU on pre-im2col'd patches: (R1, 12) @ (12, 16)
    y = jnp.maximum(dot(p1_ref[...], w1_ref[...]) + b1_ref[...], 0.0)

    # maxpool 2x2: elementwise max of the 4 window-corner row gathers (exact:
    # the gather matrices are one-hot, so the f32 matmul copies rows exactly).
    m = dot(pool_refs[0][...], y)
    for t in range(1, 4):
        m = jnp.maximum(m, dot(pool_refs[t][...], y))

    # conv2 (2x2, 16->32) + ReLU: sum over taps of (row-gather @ weight chunk)
    acc = b2_ref[...]
    for t in range(4):
        acc = acc + dot(dot(s2_refs[t][...], m), w2_refs[t][...])
    y = jnp.maximum(acc, 0.0)

    # conv3 (2x2, 32->64) + ReLU
    acc = b3_ref[...]
    for t in range(4):
        acc = acc + dot(dot(s3_refs[t][...], y), w3_refs[t][...])
    o_ref[...] = jnp.maximum(acc, 0.0)


def _one_hot_rows(rows, n_cols):
    m = np.zeros((len(rows), n_cols), np.float32)
    m[np.arange(len(rows)), rows] = 1.0
    return m


@functools.lru_cache(maxsize=None)
def _gather_plan(batch, h1, w1):
    """One-hot row-gather matrices for activations stored as (B*H*W, C) with
    rows ordered (b, h, w).  Tap order (dh, dw) = (0,0),(0,1),(1,0),(1,1)
    matches the im2col / weight-chunk ordering used everywhere else."""
    hp, wp = h1 // 2, w1 // 2          # after MaxPool2d(2, 2) (floor)
    h2, w2 = hp - 1, wp - 1            # after conv2 (2x2)
    h3, w3 = h2 - 1, w2 - 1            # after conv3 (2x2)
    pool, s2, s3 = [], [], []
    for dh in (0, 1):
        for dw in (0, 1):
            pool.append(_one_hot_rows(
                [b * h1 * w1 + (2 * oh + dh) * w1 + (2 * ow + dw)
                 for b in range(batch) for oh in range(hp) for ow in range(wp)],
                batch * h1 * w1))
            s2.append(_one_hot_rows(
                [b * hp * wp + (oh + dh) * wp + (ow + dw)
                 for b in range(batch) for oh in range(h2) for ow in range(w2)],
                batch * hp * wp))
            s3.append(_one_hot_rows(
                [b * h2 * w2 + (oh + dh) * w2 + (ow + dw)
                 for b in range(batch) for oh in range(h3) for ow in range(w3)],
                batch * h2 * w2))
    return tuple(pool), tuple(s2), tuple(s3), (h3, w3)


def fused_conv_stack(p1_both, cp, batch, h1, w1):
    """p1_both: (2, batch*h1*w1, 12) conv1 im2col patches for [image, hammer]."""
    pool, s2, s3, (h3, w3) = _gather_plan(batch, h1, w1)
    pool = [jnp.asarray(a) for a in pool]
    s2 = [jnp.asarray(a) for a in s2]
    s3 = [jnp.asarray(a) for a in s3]

    r1 = batch * h1 * w1
    rp = pool[0].shape[0]
    r2 = s2[0].shape[0]
    r3 = s3[0].shape[0]

    operands = ([p1_both, cp["conv_w1"], cp["conv_b1"]]
                + pool + s2 + list(cp["conv_w2_taps"]) + [cp["conv_b2"]]
                + s3 + list(cp["conv_w3_taps"]) + [cp["conv_b3"]])

    def stream_spec(shape):   # per-stream operand: first dim indexed by grid, squeezed
        return pl.BlockSpec((None,) + tuple(shape[1:]),
                            lambda s: (s,) + (0,) * (len(shape) - 1))

    def shared_spec(shape):   # shared constant operand
        return pl.BlockSpec(tuple(shape), lambda s: (0,) * len(shape))

    in_specs = ([stream_spec(p1_both.shape),
                 stream_spec(cp["conv_w1"].shape),
                 stream_spec(cp["conv_b1"].shape)]
                + [shared_spec(a.shape) for a in pool]
                + [shared_spec(a.shape) for a in s2]
                + [stream_spec(a.shape) for a in cp["conv_w2_taps"]]
                + [stream_spec(cp["conv_b2"].shape)]
                + [shared_spec(a.shape) for a in s3]
                + [stream_spec(a.shape) for a in cp["conv_w3_taps"]]
                + [stream_spec(cp["conv_b3"].shape)])

    flops = 2 * 2 * (r1 * 12 * 16
                     + 4 * rp * r1 * 16
                     + 4 * (r2 * rp * 16 + r2 * 16 * 32)
                     + 4 * (r3 * r2 * 32 + r3 * 32 * 64))
    bytes_accessed = 4 * (sum(int(np.prod(op.shape)) for op in operands) + 2 * r3 * 64)

    out = pl.pallas_call(
        _conv_stack_kernel,
        out_shape=jax.ShapeDtypeStruct((2, r3, 64), jnp.float32),
        grid=(2,),
        in_specs=in_specs,
        out_specs=pl.BlockSpec((None, r3, 64), lambda s: (s, 0, 0)),
        compiler_params=pltpu.CompilerParams(dimension_semantics=("parallel",)),
        cost_estimate=pl.CostEstimate(flops=int(flops), transcendentals=0,
                                      bytes_accessed=int(bytes_accessed)),
    )(*operands)
    return out, (h3, w3)


# ----------------------------------------------------------------------------
# Kernel 2: fused heads (voi, inquire, DRU regularize/gate/discretize,
#                        actor + log_softmax, critic)
# ----------------------------------------------------------------------------
def _head_kernel(eh_ref, noise_ref,
                 vw1_ref, vb1_ref, vw2_ref, vb2_ref,
                 iw1a_ref, iw1b_ref, ib1_ref, iw2_ref, ib2_ref,
                 acw_e_ref, acw_h_ref, acb_ref,
                 aw2_ref, ab2_ref, cw2_ref, cb2_ref,
                 logits_ref, value_ref, cost_ref, askd_ref,
                 *, beta, sigma, scale):
    def dot(a, b):
        return jnp.dot(a, b, preferred_element_type=jnp.float32)

    eh = eh_ref[...]
    emb, hx = eh[0], eh[1]                                    # (B, 64) each

    # voi head: Linear(64,32) -> ReLU -> Linear(32,1) -> Softplus(beta, thr=20)
    v1 = jnp.maximum(dot(hx, vw1_ref[...]) + vb1_ref[...], 0.0)
    c_pre = dot(v1, vw2_ref[...]) + vb2_ref[...]              # (B, 1)
    z = beta * c_pre
    cost = jnp.where(z > 20.0, c_pre,
                     jnp.log(1.0 + jnp.exp(jnp.minimum(z, 20.0))) / beta)

    # inquire head on [embedding | cost]: Linear(65,32) -> ReLU -> Linear(32,1)
    i1 = jnp.maximum(dot(emb, iw1a_ref[...]) + cost * iw1b_ref[...] + ib1_ref[...], 0.0)
    ask = dot(i1, iw2_ref[...]) + ib2_ref[...]                # (B, 1)

    # DRU.regularize: sigmoid(ask + N(0,1)*sigma); gate hammer features / cost;
    # DRU.discretize (soft): sigmoid((1[ask>0.5] - 0.5) * 40)
    ask_r = 1.0 / (1.0 + jnp.exp(-(ask + noise_ref[...] * sigma)))
    hx_g = hx * ask_r
    cost_g = cost * ask_r
    ask_d = 1.0 / (1.0 + jnp.exp(-(((ask_r > 0.5).astype(jnp.float32) - 0.5) * scale)))

    # actor-l1 and critic-l1 fused along N into one lane-dense (.., 128) matmul:
    # columns [0:64] = actor Tanh hidden, [64:128] = critic Tanh hidden.
    h = jnp.tanh(dot(emb, acw_e_ref[...]) + dot(hx_g, acw_h_ref[...]) + acb_ref[...])

    # second layers consume the full 128-wide h through zero-padded weights
    # (exact: the zero rows contribute exactly 0; avoids in-kernel lane slicing).
    logits = dot(h, aw2_ref[...]) + ab2_ref[...]              # (B, n_actions)
    logits = logits - jnp.max(logits, axis=-1, keepdims=True)
    logits = logits - jnp.log(jnp.sum(jnp.exp(logits), axis=-1, keepdims=True))
    value = dot(h, cw2_ref[...]) + cb2_ref[...]               # (B, 1)

    logits_ref[...] = logits
    value_ref[...] = value
    cost_ref[...] = cost_g
    askd_ref[...] = ask_d


def fused_heads(emb_all, noise, hp, n_actions, beta=50.0, sigma=2.0, scale=40.0):
    batch = noise.shape[0]
    operands = [emb_all, noise,
                hp["voi_w1"], hp["voi_b1"], hp["voi_w2"], hp["voi_b2"],
                hp["inq_w1_emb"], hp["inq_w1_cost"], hp["inq_b1"],
                hp["inq_w2"], hp["inq_b2"],
                hp["ac1_w_emb"], hp["ac1_w_ham"], hp["ac1_b"],
                hp["act_w2_pad"], hp["act_b2"], hp["cri_w2_pad"], hp["cri_b2"]]
    in_specs = [pl.BlockSpec(tuple(op.shape), lambda i, nd=op.ndim: (0,) * nd)
                for op in operands]
    out_shapes = (
        jax.ShapeDtypeStruct((batch, n_actions), jnp.float32),  # log-softmax logits
        jax.ShapeDtypeStruct((batch, 1), jnp.float32),          # value
        jax.ShapeDtypeStruct((batch, 1), jnp.float32),          # gated cost
        jax.ShapeDtypeStruct((batch, 1), jnp.float32),          # discretized ask
    )
    out_specs = tuple(pl.BlockSpec(tuple(s.shape), lambda i, nd=len(s.shape): (0,) * nd)
                      for s in out_shapes)
    kernel = functools.partial(_head_kernel, beta=float(beta),
                               sigma=float(sigma), scale=float(scale))
    flops = 2 * batch * (64 * 32 + 32 + 64 * 32 + 32 + 2 * 64 * 128
                         + 128 * n_actions + 128)
    transcendentals = batch * (8 + 128 + 2 * n_actions)
    bytes_accessed = 4 * (sum(int(np.prod(op.shape)) for op in operands)
                          + batch * (n_actions + 3))
    return pl.pallas_call(
        kernel,
        out_shape=out_shapes,
        grid=(1,),
        in_specs=in_specs,
        out_specs=out_specs,
        compiler_params=pltpu.CompilerParams(dimension_semantics=("arbitrary",)),
        cost_estimate=pl.CostEstimate(flops=int(flops),
                                      transcendentals=int(transcendentals),
                                      bytes_accessed=int(bytes_accessed)),
    )(*operands)


# ----------------------------------------------------------------------------
# Parameters (deterministic, synthetic; matches init_params semantics for Linear)
# ----------------------------------------------------------------------------
def make_params(key, n_actions):
    keys = iter(jax.random.split(key, 16))

    def conv_p(cin, cout):
        fan_in = 4 * cin
        w = jax.random.normal(next(keys), (fan_in, cout), jnp.float32) / jnp.sqrt(fan_in)
        return w, jnp.zeros((1, cout), jnp.float32)

    def lin_p(cin, cout):
        # init_params: N(0,1), each output row normalized to unit norm, bias = 0
        w = jax.random.normal(next(keys), (cin, cout), jnp.float32)
        w = w / jnp.sqrt(jnp.sum(w * w, axis=0, keepdims=True))
        return w, jnp.zeros((1, cout), jnp.float32)

    p = {}
    p["img_w1"], p["img_b1"] = conv_p(3, 16)
    p["img_w2"], p["img_b2"] = conv_p(16, 32)
    p["img_w3"], p["img_b3"] = conv_p(32, 64)
    p["ham_w1"], p["ham_b1"] = conv_p(3, 16)
    p["ham_w2"], p["ham_b2"] = conv_p(16, 32)
    p["ham_w3"], p["ham_b3"] = conv_p(32, 64)
    p["voi_w1"], p["voi_b1"] = lin_p(64, 32)
    p["voi_w2"], p["voi_b2"] = lin_p(32, 1)
    p["inq_w1"], p["inq_b1"] = lin_p(64 + 1, 32)
    p["inq_w2"], p["inq_b2"] = lin_p(32, 1)
    p["act_w1"], p["act_b1"] = lin_p(128, 64)
    p["act_w2"], p["act_b2"] = lin_p(64, n_actions)
    p["cri_w1"], p["cri_b1"] = lin_p(128, 64)
    p["cri_w2"], p["cri_b2"] = lin_p(64, 1)
    return p


def pack_params(p):
    """One-time (outside jit) repack of spec-layout params into the fused-kernel
    layout: image/hammer conv weights stacked along a stream axis, conv2/conv3
    weights chunked per 2x2 tap, inquire-l1 split [emb rows | cost row], and
    actor-l1/critic-l1 fused along N with zero-padded second layers."""
    f32 = jnp.float32

    def stack2(a, b):
        return jnp.stack([a, b], axis=0).astype(f32)

    def chunk_taps(img_w, ham_w, cin):
        return tuple(stack2(img_w[t * cin:(t + 1) * cin], ham_w[t * cin:(t + 1) * cin])
                     for t in range(4))

    n_actions = p["act_w2"].shape[1]
    e_img = p["inq_w1"].shape[0] - 1          # image embedding size (64)
    return {
        # conv stack (stream 0 = image, stream 1 = hammer_image)
        "conv_w1": stack2(p["img_w1"], p["ham_w1"]),              # (2, 12, 16)
        "conv_b1": stack2(p["img_b1"], p["ham_b1"]),              # (2, 1, 16)
        "conv_w2_taps": chunk_taps(p["img_w2"], p["ham_w2"], 16),  # 4 x (2, 16, 32)
        "conv_b2": stack2(p["img_b2"], p["ham_b2"]),              # (2, 1, 32)
        "conv_w3_taps": chunk_taps(p["img_w3"], p["ham_w3"], 32),  # 4 x (2, 32, 64)
        "conv_b3": stack2(p["img_b3"], p["ham_b3"]),              # (2, 1, 64)
        # voi head
        "voi_w1": p["voi_w1"], "voi_b1": p["voi_b1"],
        "voi_w2": p["voi_w2"], "voi_b2": p["voi_b2"],
        # inquire head (layer-1 split into embedding rows / cost row)
        "inq_w1_emb": p["inq_w1"][:-1], "inq_w1_cost": p["inq_w1"][-1:],
        "inq_b1": p["inq_b1"], "inq_w2": p["inq_w2"], "inq_b2": p["inq_b2"],
        # actor-l1 / critic-l1 fused along N (lane-dense 128-wide hidden),
        # split along K into embedding / gated-hammer halves
        "ac1_w_emb": jnp.concatenate([p["act_w1"][:e_img], p["cri_w1"][:e_img]], axis=1),
        "ac1_w_ham": jnp.concatenate([p["act_w1"][e_img:], p["cri_w1"][e_img:]], axis=1),
        "ac1_b": jnp.concatenate([p["act_b1"], p["cri_b1"]], axis=1),
        # second layers zero-padded to consume the fused 128-wide hidden
        "act_w2_pad": jnp.concatenate(
            [p["act_w2"], jnp.zeros((p["cri_w1"].shape[1], n_actions), f32)], axis=0),
        "act_b2": p["act_b2"],
        "cri_w2_pad": jnp.concatenate(
            [jnp.zeros((p["act_w1"].shape[1], 1), f32), p["cri_w2"]], axis=0),
        "cri_b2": p["cri_b2"],
    }


# ----------------------------------------------------------------------------
# VoI forward (strategy='voi', use_hammer=True, use_memory=False, use_text=False)
# ----------------------------------------------------------------------------
def voi_forward(packed, image, hammer_image, noise, memory):
    batch, H, W, _ = image.shape
    h1, w1 = H - 1, W - 1

    # conv1 im2col of the raw inputs (only XLA-side layout glue); patch channel
    # order (dh, dw, cin) matches the conv weight row layout.
    x = jnp.stack([image, hammer_image], axis=0)                       # (2,B,H,W,3)
    p1 = jnp.concatenate(
        [x[:, :, :-1, :-1, :], x[:, :, :-1, 1:, :],
         x[:, :, 1:, :-1, :], x[:, :, 1:, 1:, :]], axis=-1)            # (2,B,h1,w1,12)
    p1 = p1.reshape(2, batch * h1 * w1, 12)

    conv_out, (h3, w3) = fused_conv_stack(p1, packed, batch, h1, w1)   # (2,B*h3*w3,64)

    if h3 * w3 == 1:
        emb_all = conv_out                                             # (2, B, 64)
    else:
        # replicate PyTorch's NCHW flatten for non-degenerate spatial sizes
        emb_all = conv_out.reshape(2, batch, h3, w3, 64)
        emb_all = jnp.transpose(emb_all, (0, 1, 4, 2, 3)).reshape(2, batch, h3 * w3 * 64)

    n_actions = packed["act_b2"].shape[1]
    logits, value, cost_g, ask_d = fused_heads(emb_all, noise, packed, n_actions,
                                               beta=50.0, sigma=2.0, scale=40.0)
    # use_memory=False: memory is passed through unchanged.
    # TODO(synk): the Categorical distribution object has no Pallas equivalent;
    # its log-probability logits (the sufficient statistic) are returned instead.
    return logits, value[:, 0], cost_g, ask_d, memory


if __name__ == "__main__":
    B, H, W = 4, 7, 7          # obs_space['image'] = (7, 7, 3) -> image_embedding_size = 64
    n_actions = 7

    key = jax.random.PRNGKey(0)
    k_img, k_ham, k_noise, k_param = jax.random.split(key, 4)
    image = jax.random.uniform(k_img, (B, H, W, 3), dtype=jnp.float32)
    hammer_image = jax.random.uniform(k_ham, (B, H, W, 3), dtype=jnp.float32)
    # torch.randn noise of DRU.regularize, precomputed deterministically here
    noise = jax.random.normal(k_noise, (B, 1), dtype=jnp.float32)
    memory = jnp.zeros((B, 2 * 64), jnp.float32)

    params = make_params(k_param, n_actions)
    packed = pack_params(params)   # one-time repack into the fused-kernel layout

    fwd = jax.jit(voi_forward)
    out = fwd(packed, image, hammer_image, noise, memory)
    jax.block_until_ready(out)

    dist_logits, value, cost, ask_d, mem_out = out
    assert dist_logits.shape == (B, n_actions)
    assert value.shape == (B,)
    assert cost.shape == (B, 1)
    assert ask_d.shape == (B, 1)
    assert mem_out.shape == (B, 128)
    print("KERNEL_OK")
</pallas_src>

<mosaic_0001>
module attributes {stable_mosaic.version = 11 : i64} {
  func.func @_conv_stack_kernel(%arg0: i32, %arg1: memref<1x144x12xf32, #tpu.memory_space<vmem>>, %arg2: memref<1x12x16xf32, #tpu.memory_space<vmem>>, %arg3: memref<1x1x16xf32, #tpu.memory_space<vmem>>, %arg4: memref<36x144xf32, #tpu.memory_space<vmem>>, %arg5: memref<36x144xf32, #tpu.memory_space<vmem>>, %arg6: memref<36x144xf32, #tpu.memory_space<vmem>>, %arg7: memref<36x144xf32, #tpu.memory_space<vmem>>, %arg8: memref<16x36xf32, #tpu.memory_space<vmem>>, %arg9: memref<16x36xf32, #tpu.memory_space<vmem>>, %arg10: memref<16x36xf32, #tpu.memory_space<vmem>>, %arg11: memref<16x36xf32, #tpu.memory_space<vmem>>, %arg12: memref<1x16x32xf32, #tpu.memory_space<vmem>>, %arg13: memref<1x16x32xf32, #tpu.memory_space<vmem>>, %arg14: memref<1x16x32xf32, #tpu.memory_space<vmem>>, %arg15: memref<1x16x32xf32, #tpu.memory_space<vmem>>, %arg16: memref<1x1x32xf32, #tpu.memory_space<vmem>>, %arg17: memref<4x16xf32, #tpu.memory_space<vmem>>, %arg18: memref<4x16xf32, #tpu.memory_space<vmem>>, %arg19: memref<4x16xf32, #tpu.memory_space<vmem>>, %arg20: memref<4x16xf32, #tpu.memory_space<vmem>>, %arg21: memref<1x32x64xf32, #tpu.memory_space<vmem>>, %arg22: memref<1x32x64xf32, #tpu.memory_space<vmem>>, %arg23: memref<1x32x64xf32, #tpu.memory_space<vmem>>, %arg24: memref<1x32x64xf32, #tpu.memory_space<vmem>>, %arg25: memref<1x1x64xf32, #tpu.memory_space<vmem>>, %arg26: memref<1x4x64xf32, #tpu.memory_space<vmem>>) attributes {dimension_semantics = [#tpu.dimension_semantics<parallel>], iteration_bounds = array<i64: 2>, scalar_prefetch = 0 : i64, scratch_operands = 0 : i64, tpu.core_type = #tpu.core_type<tc>, window_params = [{transform_indices = @transform_0, window_bounds = array<i64: 1, 144, 12>}, {transform_indices = @transform_1, window_bounds = array<i64: 1, 12, 16>}, {transform_indices = @transform_2, window_bounds = array<i64: 1, 1, 16>}, {pipeline_mode = #tpu.pipeline_mode<synchronous>, transform_indices = @transform_3, window_bounds = array<i64: 36, 144>}, {pipeline_mode = #tpu.pipeline_mode<synchronous>, transform_indices = @transform_4, window_bounds = array<i64: 36, 144>}, {pipeline_mode = #tpu.pipeline_mode<synchronous>, transform_indices = @transform_5, window_bounds = array<i64: 36, 144>}, {pipeline_mode = #tpu.pipeline_mode<synchronous>, transform_indices = @transform_6, window_bounds = array<i64: 36, 144>}, {pipeline_mode = #tpu.pipeline_mode<synchronous>, transform_indices = @transform_7, window_bounds = array<i64: 16, 36>}, {pipeline_mode = #tpu.pipeline_mode<synchronous>, transform_indices = @transform_8, window_bounds = array<i64: 16, 36>}, {pipeline_mode = #tpu.pipeline_mode<synchronous>, transform_indices = @transform_9, window_bounds = array<i64: 16, 36>}, {pipeline_mode = #tpu.pipeline_mode<synchronous>, transform_indices = @transform_10, window_bounds = array<i64: 16, 36>}, {transform_indices = @transform_11, window_bounds = array<i64: 1, 16, 32>}, {transform_indices = @transform_12, window_bounds = array<i64: 1, 16, 32>}, {transform_indices = @transform_13, window_bounds = array<i64: 1, 16, 32>}, {transform_indices = @transform_14, window_bounds = array<i64: 1, 16, 32>}, {transform_indices = @transform_15, window_bounds = array<i64: 1, 1, 32>}, {pipeline_mode = #tpu.pipeline_mode<synchronous>, transform_indices = @transform_16, window_bounds = array<i64: 4, 16>}, {pipeline_mode = #tpu.pipeline_mode<synchronous>, transform_indices = @transform_17, window_bounds = array<i64: 4, 16>}, {pipeline_mode = #tpu.pipeline_mode<synchronous>, transform_indices = @transform_18, window_bounds = array<i64: 4, 16>}, {pipeline_mode = #tpu.pipeline_mode<synchronous>, transform_indices = @transform_19, window_bounds = array<i64: 4, 16>}, {transform_indices = @transform_20, window_bounds = array<i64: 1, 32, 64>}, {transform_indices = @transform_21, window_bounds = array<i64: 1, 32, 64>}, {transform_indices = @transform_22, window_bounds = array<i64: 1, 32, 64>}, {transform_indices = @transform_23, window_bounds = array<i64: 1, 32, 64>}, {transform_indices = @transform_24, window_bounds = array<i64: 1, 1, 64>}, {transform_indices = @transform_25, window_bounds = array<i64: 1, 4, 64>}]} {
    %c0 = arith.constant 0 : index
    %c0_0 = arith.constant 0 : index
    %c0_1 = arith.constant 0 : index
    %0 = vector.load %arg1[%c0, %c0_0, %c0_1] : memref<1x144x12xf32, #tpu.memory_space<vmem>>, vector<1x144x12xf32>
    %1 = vector.shape_cast %0 : vector<1x144x12xf32> to vector<144x12xf32>
    %c0_2 = arith.constant 0 : index
    %c0_3 = arith.constant 0 : index
    %c0_4 = arith.constant 0 : index
    %2 = vector.load %arg2[%c0_2, %c0_3, %c0_4] : memref<1x12x16xf32, #tpu.memory_space<vmem>>, vector<1x12x16xf32>
    %3 = vector.shape_cast %2 : vector<1x12x16xf32> to vector<12x16xf32>
    %cst = arith.constant dense<0.000000e+00> : vector<144x16xf32>
    %4 = tpu.matmul %1, %3, %cst {dimension_numbers = #tpu.dot_dimension_numbers<[1], [0], [0], [1], [0, 0, 1, 1], [], []>} : vector<144x12xf32>, vector<12x16xf32>, vector<144x16xf32> -> vector<144x16xf32>
    %c0_5 = arith.constant 0 : index
    %c0_6 = arith.constant 0 : index
    %c0_7 = arith.constant 0 : index
    %5 = vector.load %arg3[%c0_5, %c0_6, %c0_7] : memref<1x1x16xf32, #tpu.memory_space<vmem>>, vector<1x1x16xf32>
    %6 = vector.shape_cast %5 : vector<1x1x16xf32> to vector<1x16xf32>
    %7 = vector.broadcast %6 : vector<1x16xf32> to vector<144x16xf32>
    %8 = arith.addf %4, %7 : vector<144x16xf32>
    %cst_8 = arith.constant 0.000000e+00 : f32
    %9 = vector.broadcast %cst_8 : f32 to vector<144x16xf32>
    %10 = arith.maximumf %8, %9 : vector<144x16xf32>
    %c0_9 = arith.constant 0 : index
    %c0_10 = arith.constant 0 : index
    %11 = vector.load %arg4[%c0_9, %c0_10] : memref<36x144xf32, #tpu.memory_space<vmem>>, vector<36x144xf32>
    %cst_11 = arith.constant dense<0.000000e+00> : vector<36x16xf32>
    %12 = tpu.matmul %11, %10, %cst_11 {dimension_numbers = #tpu.dot_dimension_numbers<[1], [0], [0], [1], [0, 0, 1, 1], [], []>} : vector<36x144xf32>, vector<144x16xf32>, vector<36x16xf32> -> vector<36x16xf32>
    %c0_12 = arith.constant 0 : index
    %c0_13 = arith.constant 0 : index
    %13 = vector.load %arg5[%c0_12, %c0_13] : memref<36x144xf32, #tpu.memory_space<vmem>>, vector<36x144xf32>
    %cst_14 = arith.constant dense<0.000000e+00> : vector<36x16xf32>
    %14 = tpu.matmul %13, %10, %cst_14 {dimension_numbers = #tpu.dot_dimension_numbers<[1], [0], [0], [1], [0, 0, 1, 1], [], []>} : vector<36x144xf32>, vector<144x16xf32>, vector<36x16xf32> -> vector<36x16xf32>
    %15 = arith.maximumf %12, %14 : vector<36x16xf32>
    %c0_15 = arith.constant 0 : index
    %c0_16 = arith.constant 0 : index
    %16 = vector.load %arg6[%c0_15, %c0_16] : memref<36x144xf32, #tpu.memory_space<vmem>>, vector<36x144xf32>
    %cst_17 = arith.constant dense<0.000000e+00> : vector<36x16xf32>
    %17 = tpu.matmul %16, %10, %cst_17 {dimension_numbers = #tpu.dot_dimension_numbers<[1], [0], [0], [1], [0, 0, 1, 1], [], []>} : vector<36x144xf32>, vector<144x16xf32>, vector<36x16xf32> -> vector<36x16xf32>
    %18 = arith.maximumf %15, %17 : vector<36x16xf32>
    %c0_18 = arith.constant 0 : index
    %c0_19 = arith.constant 0 : index
    %19 = vector.load %arg7[%c0_18, %c0_19] : memref<36x144xf32, #tpu.memory_space<vmem>>, vector<36x144xf32>
    %cst_20 = arith.constant dense<0.000000e+00> : vector<36x16xf32>
    %20 = tpu.matmul %19, %10, %cst_20 {dimension_numbers = #tpu.dot_dimension_numbers<[1], [0], [0], [1], [0, 0, 1, 1], [], []>} : vector<36x144xf32>, vector<144x16xf32>, vector<36x16xf32> -> vector<36x16xf32>
    %21 = arith.maximumf %18, %20 : vector<36x16xf32>
    %c0_21 = arith.constant 0 : index
    %c0_22 = arith.constant 0 : index
    %c0_23 = arith.constant 0 : index
    %22 = vector.load %arg16[%c0_21, %c0_22, %c0_23] : memref<1x1x32xf32, #tpu.memory_space<vmem>>, vector<1x1x32xf32>
    %23 = vector.shape_cast %22 : vector<1x1x32xf32> to vector<1x32xf32>
    %c0_24 = arith.constant 0 : index
    %c0_25 = arith.constant 0 : index
    %24 = vector.load %arg8[%c0_24, %c0_25] : memref<16x36xf32, #tpu.memory_space<vmem>>, vector<16x36xf32>
    %cst_26 = arith.constant dense<0.000000e+00> : vector<16x16xf32>
    %25 = tpu.matmul %24, %21, %cst_26 {dimension_numbers = #tpu.dot_dimension_numbers<[1], [0], [0], [1], [0, 0, 1, 1], [], []>} : vector<16x36xf32>, vector<36x16xf32>, vector<16x16xf32> -> vector<16x16xf32>
    %c0_27 = arith.constant 0 : index
    %c0_28 = arith.constant 0 : index
    %c0_29 = arith.constant 0 : index
    %26 = vector.load %arg12[%c0_27, %c0_28, %c0_29] : memref<1x16x32xf32, #tpu.memory_space<vmem>>, vector<1x16x32xf32>
    %27 = vector.shape_cast %26 : vector<1x16x32xf32> to vector<16x32xf32>
    %cst_30 = arith.constant dense<0.000000e+00> : vector<16x32xf32>
    %28 = tpu.matmul %25, %27, %cst_30 {dimension_numbers = #tpu.dot_dimension_numbers<[1], [0], [0], [1], [0, 0, 1, 1], [], []>} : vector<16x16xf32>, vector<16x32xf32>, vector<16x32xf32> -> vector<16x32xf32>
    %29 = vector.broadcast %23 : vector<1x32xf32> to vector<16x32xf32>
    %30 = arith.addf %29, %28 : vector<16x32xf32>
    %c0_31 = arith.constant 0 : index
    %c0_32 = arith.constant 0 : index
    %31 = vector.load %arg9[%c0_31, %c0_32] : memref<16x36xf32, #tpu.memory_space<vmem>>, vector<16x36xf32>
    %cst_33 = arith.constant dense<0.000000e+00> : vector<16x16xf32>
    %32 = tpu.matmul %31, %21, %cst_33 {dimension_numbers = #tpu.dot_dimension_numbers<[1], [0], [0], [1], [0, 0, 1, 1], [], []>} : vector<16x36xf32>, vector<36x16xf32>, vector<16x16xf32> -> vector<16x16xf32>
    %c0_34 = arith.constant 0 : index
    %c0_35 = arith.constant 0 : index
    %c0_36 = arith.constant 0 : index
    %33 = vector.load %arg13[%c0_34, %c0_35, %c0_36] : memref<1x16x32xf32, #tpu.memory_space<vmem>>, vector<1x16x32xf32>
    %34 = vector.shape_cast %33 : vector<1x16x32xf32> to vector<16x32xf32>
    %cst_37 = arith.constant dense<0.000000e+00> : vector<16x32xf32>
    %35 = tpu.matmul %32, %34, %cst_37 {dimension_numbers = #tpu.dot_dimension_numbers<[1], [0], [0], [1], [0, 0, 1, 1], [], []>} : vector<16x16xf32>, vector<16x32xf32>, vector<16x32xf32> -> vector<16x32xf32>
    %36 = arith.addf %30, %35 : vector<16x32xf32>
    %c0_38 = arith.constant 0 : index
    %c0_39 = arith.constant 0 : index
    %37 = vector.load %arg10[%c0_38, %c0_39] : memref<16x36xf32, #tpu.memory_space<vmem>>, vector<16x36xf32>
    %cst_40 = arith.constant dense<0.000000e+00> : vector<16x16xf32>
    %38 = tpu.matmul %37, %21, %cst_40 {dimension_numbers = #tpu.dot_dimension_numbers<[1], [0], [0], [1], [0, 0, 1, 1], [], []>} : vector<16x36xf32>, vector<36x16xf32>, vector<16x16xf32> -> vector<16x16xf32>
    %c0_41 = arith.constant 0 : index
    %c0_42 = arith.constant 0 : index
    %c0_43 = arith.constant 0 : index
    %39 = vector.load %arg14[%c0_41, %c0_42, %c0_43] : memref<1x16x32xf32, #tpu.memory_space<vmem>>, vector<1x16x32xf32>
    %40 = vector.shape_cast %39 : vector<1x16x32xf32> to vector<16x32xf32>
    %cst_44 = arith.constant dense<0.000000e+00> : vector<16x32xf32>
    %41 = tpu.matmul %38, %40, %cst_44 {dimension_numbers = #tpu.dot_dimension_numbers<[1], [0], [0], [1], [0, 0, 1, 1], [], []>} : vector<16x16xf32>, vector<16x32xf32>, vector<16x32xf32> -> vector<16x32xf32>
    %42 = arith.addf %36, %41 : vector<16x32xf32>
    %c0_45 = arith.constant 0 : index
    %c0_46 = arith.constant 0 : index
    %43 = vector.load %arg11[%c0_45, %c0_46] : memref<16x36xf32, #tpu.memory_space<vmem>>, vector<16x36xf32>
    %cst_47 = arith.constant dense<0.000000e+00> : vector<16x16xf32>
    %44 = tpu.matmul %43, %21, %cst_47 {dimension_numbers = #tpu.dot_dimension_numbers<[1], [0], [0], [1], [0, 0, 1, 1], [], []>} : vector<16x36xf32>, vector<36x16xf32>, vector<16x16xf32> -> vector<16x16xf32>
    %c0_48 = arith.constant 0 : index
    %c0_49 = arith.constant 0 : index
    %c0_50 = arith.constant 0 : index
    %45 = vector.load %arg15[%c0_48, %c0_49, %c0_50] : memref<1x16x32xf32, #tpu.memory_space<vmem>>, vector<1x16x32xf32>
    %46 = vector.shape_cast %45 : vector<1x16x32xf32> to vector<16x32xf32>
    %cst_51 = arith.constant dense<0.000000e+00> : vector<16x32xf32>
    %47 = tpu.matmul %44, %46, %cst_51 {dimension_numbers = #tpu.dot_dimension_numbers<[1], [0], [0], [1], [0, 0, 1, 1], [], []>} : vector<16x16xf32>, vector<16x32xf32>, vector<16x32xf32> -> vector<16x32xf32>
    %48 = arith.addf %42, %47 : vector<16x32xf32>
    %cst_52 = arith.constant 0.000000e+00 : f32
    %49 = vector.broadcast %cst_52 : f32 to vector<16x32xf32>
    %50 = arith.maximumf %48, %49 : vector<16x32xf32>
    %c0_53 = arith.constant 0 : index
    %c0_54 = arith.constant 0 : index
    %c0_55 = arith.constant 0 : index
    %51 = vector.load %arg25[%c0_53, %c0_54, %c0_55] : memref<1x1x64xf32, #tpu.memory_space<vmem>>, vector<1x1x64xf32>
    %52 = vector.shape_cast %51 : vector<1x1x64xf32> to vector<1x64xf32>
    %c0_56 = arith.constant 0 : index
    %c0_57 = arith.constant 0 : index
    %53 = vector.load %arg17[%c0_56, %c0_57] : memref<4x16xf32, #tpu.memory_space<vmem>>, vector<4x16xf32>
    %cst_58 = arith.constant dense<0.000000e+00> : vector<4x32xf32>
    %54 = tpu.matmul %53, %50, %cst_58 {dimension_numbers = #tpu.dot_dimension_numbers<[1], [0], [0], [1], [0, 0, 1, 1], [], []>} : vector<4x16xf32>, vector<16x32xf32>, vector<4x32xf32> -> vector<4x32xf32>
    %c0_59 = arith.constant 0 : index
    %c0_60 = arith.constant 0 : index
    %c0_61 = arith.constant 0 : index
    %55 = vector.load %arg21[%c0_59, %c0_60, %c0_61] : memref<1x32x64xf32, #tpu.memory_space<vmem>>, vector<1x32x64xf32>
    %56 = vector.shape_cast %55 : vector<1x32x64xf32> to vector<32x64xf32>
    %cst_62 = arith.constant dense<0.000000e+00> : vector<4x64xf32>
    %57 = tpu.matmul %54, %56, %cst_62 {dimension_numbers = #tpu.dot_dimension_numbers<[1], [0], [0], [1], [0, 0, 1, 1], [], []>} : vector<4x32xf32>, vector<32x64xf32>, vector<4x64xf32> -> vector<4x64xf32>
    %58 = vector.broadcast %52 : vector<1x64xf32> to vector<4x64xf32>
    %59 = arith.addf %58, %57 : vector<4x64xf32>
    %c0_63 = arith.constant 0 : index
    %c0_64 = arith.constant 0 : index
    %60 = vector.load %arg18[%c0_63, %c0_64] : memref<4x16xf32, #tpu.memory_space<vmem>>, vector<4x16xf32>
    %cst_65 = arith.constant dense<0.000000e+00> : vector<4x32xf32>
    %61 = tpu.matmul %60, %50, %cst_65 {dimension_numbers = #tpu.dot_dimension_numbers<[1], [0], [0], [1], [0, 0, 1, 1], [], []>} : vector<4x16xf32>, vector<16x32xf32>, vector<4x32xf32> -> vector<4x32xf32>
    %c0_66 = arith.constant 0 : index
    %c0_67 = arith.constant 0 : index
    %c0_68 = arith.constant 0 : index
    %62 = vector.load %arg22[%c0_66, %c0_67, %c0_68] : memref<1x32x64xf32, #tpu.memory_space<vmem>>, vector<1x32x64xf32>
    %63 = vector.shape_cast %62 : vector<1x32x64xf32> to vector<32x64xf32>
    %cst_69 = arith.constant dense<0.000000e+00> : vector<4x64xf32>
    %64 = tpu.matmul %61, %63, %cst_69 {dimension_numbers = #tpu.dot_dimension_numbers<[1], [0], [0], [1], [0, 0, 1, 1], [], []>} : vector<4x32xf32>, vector<32x64xf32>, vector<4x64xf32> -> vector<4x64xf32>
    %65 = arith.addf %59, %64 : vector<4x64xf32>
    %c0_70 = arith.constant 0 : index
    %c0_71 = arith.constant 0 : index
    %66 = vector.load %arg19[%c0_70, %c0_71] : memref<4x16xf32, #tpu.memory_space<vmem>>, vector<4x16xf32>
    %cst_72 = arith.constant dense<0.000000e+00> : vector<4x32xf32>
    %67 = tpu.matmul %66, %50, %cst_72 {dimension_numbers = #tpu.dot_dimension_numbers<[1], [0], [0], [1], [0, 0, 1, 1], [], []>} : vector<4x16xf32>, vector<16x32xf32>, vector<4x32xf32> -> vector<4x32xf32>
    %c0_73 = arith.constant 0 : index
    %c0_74 = arith.constant 0 : index
    %c0_75 = arith.constant 0 : index
    %68 = vector.load %arg23[%c0_73, %c0_74, %c0_75] : memref<1x32x64xf32, #tpu.memory_space<vmem>>, vector<1x32x64xf32>
    %69 = vector.shape_cast %68 : vector<1x32x64xf32> to vector<32x64xf32>
    %cst_76 = arith.constant dense<0.000000e+00> : vector<4x64xf32>
    %70 = tpu.matmul %67, %69, %cst_76 {dimension_numbers = #tpu.dot_dimension_numbers<[1], [0], [0], [1], [0, 0, 1, 1], [], []>} : vector<4x32xf32>, vector<32x64xf32>, vector<4x64xf32> -> vector<4x64xf32>
    %71 = arith.addf %65, %70 : vector<4x64xf32>
    %c0_77 = arith.constant 0 : index
    %c0_78 = arith.constant 0 : index
    %72 = vector.load %arg20[%c0_77, %c0_78] : memref<4x16xf32, #tpu.memory_space<vmem>>, vector<4x16xf32>
    %cst_79 = arith.constant dense<0.000000e+00> : vector<4x32xf32>
    %73 = tpu.matmul %72, %50, %cst_79 {dimension_numbers = #tpu.dot_dimension_numbers<[1], [0], [0], [1], [0, 0, 1, 1], [], []>} : vector<4x16xf32>, vector<16x32xf32>, vector<4x32xf32> -> vector<4x32xf32>
    %c0_80 = arith.constant 0 : index
    %c0_81 = arith.constant 0 : index
    %c0_82 = arith.constant 0 : index
    %74 = vector.load %arg24[%c0_80, %c0_81, %c0_82] : memref<1x32x64xf32, #tpu.memory_space<vmem>>, vector<1x32x64xf32>
    %75 = vector.shape_cast %74 : vector<1x32x64xf32> to vector<32x64xf32>
    %cst_83 = arith.constant dense<0.000000e+00> : vector<4x64xf32>
    %76 = tpu.matmul %73, %75, %cst_83 {dimension_numbers = #tpu.dot_dimension_numbers<[1], [0], [0], [1], [0, 0, 1, 1], [], []>} : vector<4x32xf32>, vector<32x64xf32>, vector<4x64xf32> -> vector<4x64xf32>
    %77 = arith.addf %71, %76 : vector<4x64xf32>
    %cst_84 = arith.constant 0.000000e+00 : f32
    %78 = vector.broadcast %cst_84 : f32 to vector<4x64xf32>
    %79 = arith.maximumf %77, %78 : vector<4x64xf32>
    %c0_85 = arith.constant 0 : index
    %c0_86 = arith.constant 0 : index
    %c0_87 = arith.constant 0 : index
    %80 = vector.load %arg26[%c0_85, %c0_86, %c0_87] : memref<1x4x64xf32, #tpu.memory_space<vmem>>, vector<1x4x64xf32>
    %81 = vector.shape_cast %80 : vector<1x4x64xf32> to vector<4x64xf32>
    %82 = vector.shape_cast %79 : vector<4x64xf32> to vector<1x4x64xf32>
    tpu.vector_store %arg26[%c0_85, %c0_86, %c0_87], %82 {strides = array<i32>} : memref<1x4x64xf32, #tpu.memory_space<vmem>>, vector<1x4x64xf32>,
    return
  }
  func.func @transform_0(%arg0: i32) -> (i32, i32, i32) {
    %c0_i32 = arith.constant 0 : i32
    %c0_i32_0 = arith.constant 0 : i32
    %c0_i32_1 = arith.constant 0 : i32
    return %arg0, %c0_i32, %c0_i32_0 : i32, i32, i32
  }
  func.func @transform_1(%arg0: i32) -> (i32, i32, i32) {
    %c0_i32 = arith.constant 0 : i32
    %c0_i32_0 = arith.constant 0 : i32
    %c0_i32_1 = arith.constant 0 : i32
    return %arg0, %c0_i32, %c0_i32_0 : i32, i32, i32
  }
  func.func @transform_2(%arg0: i32) -> (i32, i32, i32) {
    %c0_i32 = arith.constant 0 : i32
    %c0_i32_0 = arith.constant 0 : i32
    %c0_i32_1 = arith.constant 0 : i32
    return %arg0, %c0_i32, %c0_i32_0 : i32, i32, i32
  }
  func.func @transform_3(%arg0: i32) -> (i32, i32) {
    %c0_i32 = arith.constant 0 : i32
    %c0_i32_0 = arith.constant 0 : i32
    %c0_i32_1 = arith.constant 0 : i32
    return %c0_i32, %c0_i32_0 : i32, i32
  }
  func.func @transform_4(%arg0: i32) -> (i32, i32) {
    %c0_i32 = arith.constant 0 : i32
    %c0_i32_0 = arith.constant 0 : i32
    %c0_i32_1 = arith.constant 0 : i32
    return %c0_i32, %c0_i32_0 : i32, i32
  }
  func.func @transform_5(%arg0: i32) -> (i32, i32) {
    %c0_i32 = arith.constant 0 : i32
    %c0_i32_0 = arith.constant 0 : i32
    %c0_i32_1 = arith.constant 0 : i32
    return %c0_i32, %c0_i32_0 : i32, i32
  }
  func.func @transform_6(%arg0: i32) -> (i32, i32) {
    %c0_i32 = arith.constant 0 : i32
    %c0_i32_0 = arith.constant 0 : i32
    %c0_i32_1 = arith.constant 0 : i32
    return %c0_i32, %c0_i32_0 : i32, i32
  }
  func.func @transform_7(%arg0: i32) -> (i32, i32) {
    %c0_i32 = arith.constant 0 : i32
    %c0_i32_0 = arith.constant 0 : i32
    %c0_i32_1 = arith.constant 0 : i32
    return %c0_i32, %c0_i32_0 : i32, i32
  }
  func.func @transform_8(%arg0: i32) -> (i32, i32) {
    %c0_i32 = arith.constant 0 : i32
    %c0_i32_0 = arith.constant 0 : i32
    %c0_i32_1 = arith.constant 0 : i32
    return %c0_i32, %c0_i32_0 : i32, i32
  }
  func.func @transform_9(%arg0: i32) -> (i32, i32) {
    %c0_i32 = arith.constant 0 : i32
    %c0_i32_0 = arith.constant 0 : i32
    %c0_i32_1 = arith.constant 0 : i32
    return %c0_i32, %c0_i32_0 : i32, i32
  }
  func.func @transform_10(%arg0: i32) -> (i32, i32) {
    %c0_i32 = arith.constant 0 : i32
    %c0_i32_0 = arith.constant 0 : i32
    %c0_i32_1 = arith.constant 0 : i32
    return %c0_i32, %c0_i32_0 : i32, i32
  }
  func.func @transform_11(%arg0: i32) -> (i32, i32, i32) {
    %c0_i32 = arith.constant 0 : i32
    %c0_i32_0 = arith.constant 0 : i32
    %c0_i32_1 = arith.constant 0 : i32
    return %arg0, %c0_i32, %c0_i32_0 : i32, i32, i32
  }
  func.func @transform_12(%arg0: i32) -> (i32, i32, i32) {
    %c0_i32 = arith.constant 0 : i32
    %c0_i32_0 = arith.constant 0 : i32
    %c0_i32_1 = arith.constant 0 : i32
    return %arg0, %c0_i32, %c0_i32_0 : i32, i32, i32
  }
  func.func @transform_13(%arg0: i32) -> (i32, i32, i32) {
    %c0_i32 = arith.constant 0 : i32
    %c0_i32_0 = arith.constant 0 : i32
    %c0_i32_1 = arith.constant 0 : i32
    return %arg0, %c0_i32, %c0_i32_0 : i32, i32, i32
  }
  func.func @transform_14(%arg0: i32) -> (i32, i32, i32) {
    %c0_i32 = arith.constant 0 : i32
    %c0_i32_0 = arith.constant 0 : i32
    %c0_i32_1 = arith.constant 0 : i32
    return %arg0, %c0_i32, %c0_i32_0 : i32, i32, i32
  }
  func.func @transform_15(%arg0: i32) -> (i32, i32, i32) {
    %c0_i32 = arith.constant 0 : i32
    %c0_i32_0 = arith.constant 0 : i32
    %c0_i32_1 = arith.constant 0 : i32
    return %arg0, %c0_i32, %c0_i32_0 : i32, i32, i32
  }
  func.func @transform_16(%arg0: i32) -> (i32, i32) {
    %c0_i32 = arith.constant 0 : i32
    %c0_i32_0 = arith.constant 0 : i32
    %c0_i32_1 = arith.constant 0 : i32
    return %c0_i32, %c0_i32_0 : i32, i32
  }
  func.func @transform_17(%arg0: i32) -> (i32, i32) {
    %c0_i32 = arith.constant 0 : i32
    %c0_i32_0 = arith.constant 0 : i32
    %c0_i32_1 = arith.constant 0 : i32
    return %c0_i32, %c0_i32_0 : i32, i32
  }
  func.func @transform_18(%arg0: i32) -> (i32, i32) {
    %c0_i32 = arith.constant 0 : i32
    %c0_i32_0 = arith.constant 0 : i32
    %c0_i32_1 = arith.constant 0 : i32
    return %c0_i32, %c0_i32_0 : i32, i32
  }
  func.func @transform_19(%arg0: i32) -> (i32, i32) {
    %c0_i32 = arith.constant 0 : i32
    %c0_i32_0 = arith.constant 0 : i32
    %c0_i32_1 = arith.constant 0 : i32
    return %c0_i32, %c0_i32_0 : i32, i32
  }
  func.func @transform_20(%arg0: i32) -> (i32, i32, i32) {
    %c0_i32 = arith.constant 0 : i32
    %c0_i32_0 = arith.constant 0 : i32
    %c0_i32_1 = arith.constant 0 : i32
    return %arg0, %c0_i32, %c0_i32_0 : i32, i32, i32
  }
  func.func @transform_21(%arg0: i32) -> (i32, i32, i32) {
    %c0_i32 = arith.constant 0 : i32
    %c0_i32_0 = arith.constant 0 : i32
    %c0_i32_1 = arith.constant 0 : i32
    return %arg0, %c0_i32, %c0_i32_0 : i32, i32, i32
  }
  func.func @transform_22(%arg0: i32) -> (i32, i32, i32) {
    %c0_i32 = arith.constant 0 : i32
    %c0_i32_0 = arith.constant 0 : i32
    %c0_i32_1 = arith.constant 0 : i32
    return %arg0, %c0_i32, %c0_i32_0 : i32, i32, i32
  }
  func.func @transform_23(%arg0: i32) -> (i32, i32, i32) {
    %c0_i32 = arith.constant 0 : i32
    %c0_i32_0 = arith.constant 0 : i32
    %c0_i32_1 = arith.constant 0 : i32
    return %arg0, %c0_i32, %c0_i32_0 : i32, i32, i32
  }
  func.func @transform_24(%arg0: i32) -> (i32, i32, i32) {
    %c0_i32 = arith.constant 0 : i32
    %c0_i32_0 = arith.constant 0 : i32
    %c0_i32_1 = arith.constant 0 : i32
    return %arg0, %c0_i32, %c0_i32_0 : i32, i32, i32
  }
  func.func @transform_25(%arg0: i32) -> (i32, i32, i32) {
    %c0_i32 = arith.constant 0 : i32
    %c0_i32_0 = arith.constant 0 : i32
    %c0_i32_1 = arith.constant 0 : i32
    return %arg0, %c0_i32, %c0_i32_0 : i32, i32, i32
  }
}

module attributes {stable_mosaic.version = 11 : i64} {
  func.func @_head_kernel(%arg0: i32, %arg1: memref<2x4x64xf32, #tpu.memory_space<vmem>>, %arg2: memref<4x1xf32, #tpu.memory_space<vmem>>, %arg3: memref<64x32xf32, #tpu.memory_space<vmem>>, %arg4: memref<1x32xf32, #tpu.memory_space<vmem>>, %arg5: memref<32x1xf32, #tpu.memory_space<vmem>>, %arg6: memref<1x1xf32, #tpu.memory_space<vmem>>, %arg7: memref<64x32xf32, #tpu.memory_space<vmem>>, %arg8: memref<1x32xf32, #tpu.memory_space<vmem>>, %arg9: memref<1x32xf32, #tpu.memory_space<vmem>>, %arg10: memref<32x1xf32, #tpu.memory_space<vmem>>, %arg11: memref<1x1xf32, #tpu.memory_space<vmem>>, %arg12: memref<64x128xf32, #tpu.memory_space<vmem>>, %arg13: memref<64x128xf32, #tpu.memory_space<vmem>>, %arg14: memref<1x128xf32, #tpu.memory_space<vmem>>, %arg15: memref<128x7xf32, #tpu.memory_space<vmem>>, %arg16: memref<1x7xf32, #tpu.memory_space<vmem>>, %arg17: memref<128x1xf32, #tpu.memory_space<vmem>>, %arg18: memref<1x1xf32, #tpu.memory_space<vmem>>, %arg19: memref<4x7xf32, #tpu.memory_space<vmem>>, %arg20: memref<4x1xf32, #tpu.memory_space<vmem>>, %arg21: memref<4x1xf32, #tpu.memory_space<vmem>>, %arg22: memref<4x1xf32, #tpu.memory_space<vmem>>) attributes {dimension_semantics = [#tpu.dimension_semantics<arbitrary>], iteration_bounds = array<i64: 1>, scalar_prefetch = 0 : i64, scratch_operands = 0 : i64, tpu.core_type = #tpu.core_type<tc>, window_params = [{pipeline_mode = #tpu.pipeline_mode<synchronous>, transform_indices = @transform_0, window_bounds = array<i64: 2, 4, 64>}, {pipeline_mode = #tpu.pipeline_mode<synchronous>, transform_indices = @transform_1, window_bounds = array<i64: 4, 1>}, {pipeline_mode = #tpu.pipeline_mode<synchronous>, transform_indices = @transform_2, window_bounds = array<i64: 64, 32>}, {pipeline_mode = #tpu.pipeline_mode<synchronous>, transform_indices = @transform_3, window_bounds = array<i64: 1, 32>}, {pipeline_mode = #tpu.pipeline_mode<synchronous>, transform_indices = @transform_4, window_bounds = array<i64: 32, 1>}, {pipeline_mode = #tpu.pipeline_mode<synchronous>, transform_indices = @transform_5, window_bounds = array<i64: 1, 1>}, {pipeline_mode = #tpu.pipeline_mode<synchronous>, transform_indices = @transform_6, window_bounds = array<i64: 64, 32>}, {pipeline_mode = #tpu.pipeline_mode<synchronous>, transform_indices = @transform_7, window_bounds = array<i64: 1, 32>}, {pipeline_mode = #tpu.pipeline_mode<synchronous>, transform_indices = @transform_8, window_bounds = array<i64: 1, 32>}, {pipeline_mode = #tpu.pipeline_mode<synchronous>, transform_indices = @transform_9, window_bounds = array<i64: 32, 1>}, {pipeline_mode = #tpu.pipeline_mode<synchronous>, transform_indices = @transform_10, window_bounds = array<i64: 1, 1>}, {pipeline_mode = #tpu.pipeline_mode<synchronous>, transform_indices = @transform_11, window_bounds = array<i64: 64, 128>}, {pipeline_mode = #tpu.pipeline_mode<synchronous>, transform_indices = @transform_12, window_bounds = array<i64: 64, 128>}, {pipeline_mode = #tpu.pipeline_mode<synchronous>, transform_indices = @transform_13, window_bounds = array<i64: 1, 128>}, {pipeline_mode = #tpu.pipeline_mode<synchronous>, transform_indices = @transform_14, window_bounds = array<i64: 128, 7>}, {pipeline_mode = #tpu.pipeline_mode<synchronous>, transform_indices = @transform_15, window_bounds = array<i64: 1, 7>}, {pipeline_mode = #tpu.pipeline_mode<synchronous>, transform_indices = @transform_16, window_bounds = array<i64: 128, 1>}, {pipeline_mode = #tpu.pipeline_mode<synchronous>, transform_indices = @transform_17, window_bounds = array<i64: 1, 1>}, {pipeline_mode = #tpu.pipeline_mode<synchronous>, transform_indices = @transform_18, window_bounds = array<i64: 4, 7>}, {pipeline_mode = #tpu.pipeline_mode<synchronous>, transform_indices = @transform_19, window_bounds = array<i64: 4, 1>}, {pipeline_mode = #tpu.pipeline_mode<synchronous>, transform_indices = @transform_20, window_bounds = array<i64: 4, 1>}, {pipeline_mode = #tpu.pipeline_mode<synchronous>, transform_indices = @transform_21, window_bounds = array<i64: 4, 1>}]} {
    %c0 = arith.constant 0 : index
    %c0_0 = arith.constant 0 : index
    %c0_1 = arith.constant 0 : index
    %0 = vector.load %arg1[%c0, %c0_0, %c0_1] : memref<2x4x64xf32, #tpu.memory_space<vmem>>, vector<2x4x64xf32>
    %1 = vector.extract_strided_slice %0 {offsets = [0, 0, 0], sizes = [1, 4, 64], strides = [1, 1, 1]} : vector<2x4x64xf32> to vector<1x4x64xf32>
    %2 = vector.shape_cast %1 : vector<1x4x64xf32> to vector<4x64xf32>
    %3 = vector.extract_strided_slice %0 {offsets = [1, 0, 0], sizes = [1, 4, 64], strides = [1, 1, 1]} : vector<2x4x64xf32> to vector<1x4x64xf32>
    %4 = vector.shape_cast %3 : vector<1x4x64xf32> to vector<4x64xf32>
    %c0_2 = arith.constant 0 : index
    %c0_3 = arith.constant 0 : index
    %5 = vector.load %arg3[%c0_2, %c0_3] : memref<64x32xf32, #tpu.memory_space<vmem>>, vector<64x32xf32>
    %cst = arith.constant dense<0.000000e+00> : vector<4x32xf32>
    %6 = tpu.matmul %4, %5, %cst {dimension_numbers = #tpu.dot_dimension_numbers<[1], [0], [0], [1], [0, 0, 1, 1], [], []>} : vector<4x64xf32>, vector<64x32xf32>, vector<4x32xf32> -> vector<4x32xf32>
    %c0_4 = arith.constant 0 : index
    %c0_5 = arith.constant 0 : index
    %7 = vector.load %arg4[%c0_4, %c0_5] : memref<1x32xf32, #tpu.memory_space<vmem>>, vector<1x32xf32>
    %8 = vector.broadcast %7 : vector<1x32xf32> to vector<4x32xf32>
    %9 = arith.addf %6, %8 : vector<4x32xf32>
    %cst_6 = arith.constant 0.000000e+00 : f32
    %10 = vector.broadcast %cst_6 : f32 to vector<4x32xf32>
    %11 = arith.maximumf %9, %10 : vector<4x32xf32>
    %c0_7 = arith.constant 0 : index
    %c0_8 = arith.constant 0 : index
    %12 = vector.load %arg5[%c0_7, %c0_8] : memref<32x1xf32, #tpu.memory_space<vmem>>, vector<32x1xf32>
    %cst_9 = arith.constant dense<0.000000e+00> : vector<4x1xf32>
    %13 = tpu.matmul %11, %12, %cst_9 {dimension_numbers = #tpu.dot_dimension_numbers<[1], [0], [0], [1], [0, 0, 1, 1], [], []>} : vector<4x32xf32>, vector<32x1xf32>, vector<4x1xf32> -> vector<4x1xf32>
    %c0_10 = arith.constant 0 : index
    %c0_11 = arith.constant 0 : index
    %14 = vector.load %arg6[%c0_10, %c0_11] : memref<1x1xf32, #tpu.memory_space<vmem>>, vector<1x1xf32>
    %15 = vector.broadcast %14 : vector<1x1xf32> to vector<4x1xf32>
    %16 = arith.addf %13, %15 : vector<4x1xf32>
    %cst_12 = arith.constant 5.000000e+01 : f32
    %17 = vector.broadcast %cst_12 : f32 to vector<4x1xf32>
    %18 = arith.mulf %17, %16 : vector<4x1xf32>
    %cst_13 = arith.constant 2.000000e+01 : f32
    %19 = vector.broadcast %cst_13 : f32 to vector<4x1xf32>
    %20 = arith.cmpf ogt, %18, %19 : vector<4x1xf32>
    %cst_14 = arith.constant 2.000000e+01 : f32
    %21 = vector.broadcast %cst_14 : f32 to vector<4x1xf32>
    %22 = arith.minimumf %18, %21 : vector<4x1xf32>
    %23 = math.exp %22 : vector<4x1xf32>
    %cst_15 = arith.constant 1.000000e+00 : f32
    %24 = vector.broadcast %cst_15 : f32 to vector<4x1xf32>
    %25 = arith.addf %24, %23 : vector<4x1xf32>
    %26 = math.log %25 : vector<4x1xf32>
    %cst_16 = arith.constant 5.000000e+01 : f32
    %27 = vector.broadcast %cst_16 : f32 to vector<4x1xf32>
    %28 = arith.divf %26, %27 : vector<4x1xf32>
    %29 = arith.select %20, %16, %28 : vector<4x1xi1>, vector<4x1xf32>
    %c0_17 = arith.constant 0 : index
    %c0_18 = arith.constant 0 : index
    %30 = vector.load %arg7[%c0_17, %c0_18] : memref<64x32xf32, #tpu.memory_space<vmem>>, vector<64x32xf32>
    %cst_19 = arith.constant dense<0.000000e+00> : vector<4x32xf32>
    %31 = tpu.matmul %2, %30, %cst_19 {dimension_numbers = #tpu.dot_dimension_numbers<[1], [0], [0], [1], [0, 0, 1, 1], [], []>} : vector<4x64xf32>, vector<64x32xf32>, vector<4x32xf32> -> vector<4x32xf32>
    %c0_20 = arith.constant 0 : index
    %c0_21 = arith.constant 0 : index
    %32 = vector.load %arg8[%c0_20, %c0_21] : memref<1x32xf32, #tpu.memory_space<vmem>>, vector<1x32xf32>
    %33 = vector.broadcast %29 : vector<4x1xf32> to vector<4x32xf32>
    %34 = vector.broadcast %32 : vector<1x32xf32> to vector<4x32xf32>
    %35 = arith.mulf %33, %34 : vector<4x32xf32>
    %36 = arith.addf %31, %35 : vector<4x32xf32>
    %c0_22 = arith.constant 0 : index
    %c0_23 = arith.constant 0 : index
    %37 = vector.load %arg9[%c0_22, %c0_23] : memref<1x32xf32, #tpu.memory_space<vmem>>, vector<1x32xf32>
    %38 = vector.broadcast %37 : vector<1x32xf32> to vector<4x32xf32>
    %39 = arith.addf %36, %38 : vector<4x32xf32>
    %cst_24 = arith.constant 0.000000e+00 : f32
    %40 = vector.broadcast %cst_24 : f32 to vector<4x32xf32>
    %41 = arith.maximumf %39, %40 : vector<4x32xf32>
    %c0_25 = arith.constant 0 : index
    %c0_26 = arith.constant 0 : index
    %42 = vector.load %arg10[%c0_25, %c0_26] : memref<32x1xf32, #tpu.memory_space<vmem>>, vector<32x1xf32>
    %cst_27 = arith.constant dense<0.000000e+00> : vector<4x1xf32>
    %43 = tpu.matmul %41, %42, %cst_27 {dimension_numbers = #tpu.dot_dimension_numbers<[1], [0], [0], [1], [0, 0, 1, 1], [], []>} : vector<4x32xf32>, vector<32x1xf32>, vector<4x1xf32> -> vector<4x1xf32>
    %c0_28 = arith.constant 0 : index
    %c0_29 = arith.constant 0 : index
    %44 = vector.load %arg11[%c0_28, %c0_29] : memref<1x1xf32, #tpu.memory_space<vmem>>, vector<1x1xf32>
    %45 = vector.broadcast %44 : vector<1x1xf32> to vector<4x1xf32>
    %46 = arith.addf %43, %45 : vector<4x1xf32>
    %c0_30 = arith.constant 0 : index
    %c0_31 = arith.constant 0 : index
    %47 = vector.load %arg2[%c0_30, %c0_31] : memref<4x1xf32, #tpu.memory_space<vmem>>, vector<4x1xf32>
    %cst_32 = arith.constant 2.000000e+00 : f32
    %48 = vector.broadcast %cst_32 : f32 to vector<4x1xf32>
    %49 = arith.mulf %47, %48 : vector<4x1xf32>
    %50 = arith.addf %46, %49 : vector<4x1xf32>
    %cst_33 = arith.constant 0.000000e+00 : f32
    %51 = vector.broadcast %cst_33 : f32 to vector<4x1xf32>
    %52 = arith.subf %51, %50 : vector<4x1xf32>
    %53 = math.exp %52 : vector<4x1xf32>
    %cst_34 = arith.constant 1.000000e+00 : f32
    %54 = vector.broadcast %cst_34 : f32 to vector<4x1xf32>
    %55 = arith.addf %54, %53 : vector<4x1xf32>
    %cst_35 = arith.constant 1.000000e+00 : f32
    %56 = vector.broadcast %cst_35 : f32 to vector<4x1xf32>
    %57 = arith.divf %56, %55 : vector<4x1xf32>
    %58 = vector.broadcast %57 : vector<4x1xf32> to vector<4x64xf32>
    %59 = arith.mulf %4, %58 : vector<4x64xf32>
    %60 = arith.mulf %29, %57 : vector<4x1xf32>
    %cst_36 = arith.constant 5.000000e-01 : f32
    %61 = vector.broadcast %cst_36 : f32 to vector<4x1xf32>
    %62 = arith.cmpf ogt, %57, %61 : vector<4x1xf32>
    %63 = arith.extui %62 : vector<4x1xi1> to vector<4x1xi32>
    %64 = arith.sitofp %63 : vector<4x1xi32> to vector<4x1xf32>
    %cst_37 = arith.constant 5.000000e-01 : f32
    %65 = vector.broadcast %cst_37 : f32 to vector<4x1xf32>
    %66 = arith.subf %64, %65 : vector<4x1xf32>
    %cst_38 = arith.constant 4.000000e+01 : f32
    %67 = vector.broadcast %cst_38 : f32 to vector<4x1xf32>
    %68 = arith.mulf %66, %67 : vector<4x1xf32>
    %cst_39 = arith.constant 0.000000e+00 : f32
    %69 = vector.broadcast %cst_39 : f32 to vector<4x1xf32>
    %70 = arith.subf %69, %68 : vector<4x1xf32>
    %71 = math.exp %70 : vector<4x1xf32>
    %cst_40 = arith.constant 1.000000e+00 : f32
    %72 = vector.broadcast %cst_40 : f32 to vector<4x1xf32>
    %73 = arith.addf %72, %71 : vector<4x1xf32>
    %cst_41 = arith.constant 1.000000e+00 : f32
    %74 = vector.broadcast %cst_41 : f32 to vector<4x1xf32>
    %75 = arith.divf %74, %73 : vector<4x1xf32>
    %c0_42 = arith.constant 0 : index
    %c0_43 = arith.constant 0 : index
    %76 = vector.load %arg12[%c0_42, %c0_43] : memref<64x128xf32, #tpu.memory_space<vmem>>, vector<64x128xf32>
    %cst_44 = arith.constant dense<0.000000e+00> : vector<4x128xf32>
    %77 = tpu.matmul %2, %76, %cst_44 {dimension_numbers = #tpu.dot_dimension_numbers<[1], [0], [0], [1], [0, 0, 1, 1], [], []>} : vector<4x64xf32>, vector<64x128xf32>, vector<4x128xf32> -> vector<4x128xf32>
    %c0_45 = arith.constant 0 : index
    %c0_46 = arith.constant 0 : index
    %78 = vector.load %arg13[%c0_45, %c0_46] : memref<64x128xf32, #tpu.memory_space<vmem>>, vector<64x128xf32>
    %cst_47 = arith.constant dense<0.000000e+00> : vector<4x128xf32>
    %79 = tpu.matmul %59, %78, %cst_47 {dimension_numbers = #tpu.dot_dimension_numbers<[1], [0], [0], [1], [0, 0, 1, 1], [], []>} : vector<4x64xf32>, vector<64x128xf32>, vector<4x128xf32> -> vector<4x128xf32>
    %80 = arith.addf %77, %79 : vector<4x128xf32>
    %c0_48 = arith.constant 0 : index
    %c0_49 = arith.constant 0 : index
    %81 = vector.load %arg14[%c0_48, %c0_49] : memref<1x128xf32, #tpu.memory_space<vmem>>, vector<1x128xf32>
    %82 = vector.broadcast %81 : vector<1x128xf32> to vector<4x128xf32>
    %83 = arith.addf %80, %82 : vector<4x128xf32>
    %84 = math.tanh %83 : vector<4x128xf32>
    %c0_50 = arith.constant 0 : index
    %c0_51 = arith.constant 0 : index
    %85 = vector.load %arg15[%c0_50, %c0_51] : memref<128x7xf32, #tpu.memory_space<vmem>>, vector<128x7xf32>
    %cst_52 = arith.constant dense<0.000000e+00> : vector<4x7xf32>
    %86 = tpu.matmul %84, %85, %cst_52 {dimension_numbers = #tpu.dot_dimension_numbers<[1], [0], [0], [1], [0, 0, 1, 1], [], []>} : vector<4x128xf32>, vector<128x7xf32>, vector<4x7xf32> -> vector<4x7xf32>
    %c0_53 = arith.constant 0 : index
    %c0_54 = arith.constant 0 : index
    %87 = vector.load %arg16[%c0_53, %c0_54] : memref<1x7xf32, #tpu.memory_space<vmem>>, vector<1x7xf32>
    %88 = vector.broadcast %87 : vector<1x7xf32> to vector<4x7xf32>
    %89 = arith.addf %86, %88 : vector<4x7xf32>
    %cst_55 = arith.constant dense<0xFF800000> : vector<4xf32>
    %90 = vector.multi_reduction <maximumf>, %89, %cst_55 [1] : vector<4x7xf32> to vector<4xf32>
    %91 = vector.shape_cast %90 : vector<4xf32> to vector<4x1xf32>
    %92 = vector.broadcast %91 : vector<4x1xf32> to vector<4x7xf32>
    %93 = arith.subf %89, %92 : vector<4x7xf32>
    %94 = math.exp %93 : vector<4x7xf32>
    %cst_56 = arith.constant dense<0.000000e+00> : vector<4xf32>
    %95 = vector.multi_reduction <add>, %94, %cst_56 [1] : vector<4x7xf32> to vector<4xf32>
    %96 = vector.shape_cast %95 : vector<4xf32> to vector<4x1xf32>
    %97 = math.log %96 : vector<4x1xf32>
    %98 = vector.broadcast %97 : vector<4x1xf32> to vector<4x7xf32>
    %99 = arith.subf %93, %98 : vector<4x7xf32>
    %c0_57 = arith.constant 0 : index
    %c0_58 = arith.constant 0 : index
    %100 = vector.load %arg17[%c0_57, %c0_58] : memref<128x1xf32, #tpu.memory_space<vmem>>, vector<128x1xf32>
    %cst_59 = arith.constant dense<0.000000e+00> : vector<4x1xf32>
    %101 = tpu.matmul %84, %100, %cst_59 {dimension_numbers = #tpu.dot_dimension_numbers<[1], [0], [0], [1], [0, 0, 1, 1], [], []>} : vector<4x128xf32>, vector<128x1xf32>, vector<4x1xf32> -> vector<4x1xf32>
    %c0_60 = arith.constant 0 : index
    %c0_61 = arith.constant 0 : index
    %102 = vector.load %arg18[%c0_60, %c0_61] : memref<1x1xf32, #tpu.memory_space<vmem>>, vector<1x1xf32>
    %103 = vector.broadcast %102 : vector<1x1xf32> to vector<4x1xf32>
    %104 = arith.addf %101, %103 : vector<4x1xf32>
    %c0_62 = arith.constant 0 : index
    %c0_63 = arith.constant 0 : index
    %105 = vector.load %arg19[%c0_62, %c0_63] : memref<4x7xf32, #tpu.memory_space<vmem>>, vector<4x7xf32>
    tpu.vector_store %arg19[%c0_62, %c0_63], %99 {strides = array<i32>} : memref<4x7xf32, #tpu.memory_space<vmem>>, vector<4x7xf32>,
    %c0_64 = arith.constant 0 : index
    %c0_65 = arith.constant 0 : index
    %106 = vector.load %arg20[%c0_64, %c0_65] : memref<4x1xf32, #tpu.memory_space<vmem>>, vector<4x1xf32>
    tpu.vector_store %arg20[%c0_64, %c0_65], %104 {strides = array<i32>} : memref<4x1xf32, #tpu.memory_space<vmem>>, vector<4x1xf32>,
    %c0_66 = arith.constant 0 : index
    %c0_67 = arith.constant 0 : index
    %107 = vector.load %arg21[%c0_66, %c0_67] : memref<4x1xf32, #tpu.memory_space<vmem>>, vector<4x1xf32>
    tpu.vector_store %arg21[%c0_66, %c0_67], %60 {strides = array<i32>} : memref<4x1xf32, #tpu.memory_space<vmem>>, vector<4x1xf32>,
    %c0_68 = arith.constant 0 : index
    %c0_69 = arith.constant 0 : index
    %108 = vector.load %arg22[%c0_68, %c0_69] : memref<4x1xf32, #tpu.memory_space<vmem>>, vector<4x1xf32>
    tpu.vector_store %arg22[%c0_68, %c0_69], %75 {strides = array<i32>} : memref<4x1xf32, #tpu.memory_space<vmem>>, vector<4x1xf32>,
    return
  }
  func.func @transform_0(%arg0: i32) -> (i32, i32, i32) {
    %c0_i32 = arith.constant 0 : i32
    %c0_i32_0 = arith.constant 0 : i32
    %c0_i32_1 = arith.constant 0 : i32
    %c0_i32_2 = arith.constant 0 : i32
    return %c0_i32, %c0_i32_0, %c0_i32_1 : i32, i32, i32
  }
  func.func @transform_1(%arg0: i32) -> (i32, i32) {
    %c0_i32 = arith.constant 0 : i32
    %c0_i32_0 = arith.constant 0 : i32
    %c0_i32_1 = arith.constant 0 : i32
    return %c0_i32, %c0_i32_0 : i32, i32
  }
  func.func @transform_2(%arg0: i32) -> (i32, i32) {
    %c0_i32 = arith.constant 0 : i32
    %c0_i32_0 = arith.constant 0 : i32
    %c0_i32_1 = arith.constant 0 : i32
    return %c0_i32, %c0_i32_0 : i32, i32
  }
  func.func @transform_3(%arg0: i32) -> (i32, i32) {
    %c0_i32 = arith.constant 0 : i32
    %c0_i32_0 = arith.constant 0 : i32
    %c0_i32_1 = arith.constant 0 : i32
    return %c0_i32, %c0_i32_0 : i32, i32
  }
  func.func @transform_4(%arg0: i32) -> (i32, i32) {
    %c0_i32 = arith.constant 0 : i32
    %c0_i32_0 = arith.constant 0 : i32
    %c0_i32_1 = arith.constant 0 : i32
    return %c0_i32, %c0_i32_0 : i32, i32
  }
  func.func @transform_5(%arg0: i32) -> (i32, i32) {
    %c0_i32 = arith.constant 0 : i32
    %c0_i32_0 = arith.constant 0 : i32
    %c0_i32_1 = arith.constant 0 : i32
    return %c0_i32, %c0_i32_0 : i32, i32
  }
  func.func @transform_6(%arg0: i32) -> (i32, i32) {
    %c0_i32 = arith.constant 0 : i32
    %c0_i32_0 = arith.constant 0 : i32
    %c0_i32_1 = arith.constant 0 : i32
    return %c0_i32, %c0_i32_0 : i32, i32
  }
  func.func @transform_7(%arg0: i32) -> (i32, i32) {
    %c0_i32 = arith.constant 0 : i32
    %c0_i32_0 = arith.constant 0 : i32
    %c0_i32_1 = arith.constant 0 : i32
    return %c0_i32, %c0_i32_0 : i32, i32
  }
  func.func @transform_8(%arg0: i32) -> (i32, i32) {
    %c0_i32 = arith.constant 0 : i32
    %c0_i32_0 = arith.constant 0 : i32
    %c0_i32_1 = arith.constant 0 : i32
    return %c0_i32, %c0_i32_0 : i32, i32
  }
  func.func @transform_9(%arg0: i32) -> (i32, i32) {
    %c0_i32 = arith.constant 0 : i32
    %c0_i32_0 = arith.constant 0 : i32
    %c0_i32_1 = arith.constant 0 : i32
    return %c0_i32, %c0_i32_0 : i32, i32
  }
  func.func @transform_10(%arg0: i32) -> (i32, i32) {
    %c0_i32 = arith.constant 0 : i32
    %c0_i32_0 = arith.constant 0 : i32
    %c0_i32_1 = arith.constant 0 : i32
    return %c0_i32, %c0_i32_0 : i32, i32
  }
  func.func @transform_11(%arg0: i32) -> (i32, i32) {
    %c0_i32 = arith.constant 0 : i32
    %c0_i32_0 = arith.constant 0 : i32
    %c0_i32_1 = arith.constant 0 : i32
    return %c0_i32, %c0_i32_0 : i32, i32
  }
  func.func @transform_12(%arg0: i32) -> (i32, i32) {
    %c0_i32 = arith.constant 0 : i32
    %c0_i32_0 = arith.constant 0 : i32
    %c0_i32_1 = arith.constant 0 : i32
    return %c0_i32, %c0_i32_0 : i32, i32
  }
  func.func @transform_13(%arg0: i32) -> (i32, i32) {
    %c0_i32 = arith.constant 0 : i32
    %c0_i32_0 = arith.constant 0 : i32
    %c0_i32_1 = arith.constant 0 : i32
    return %c0_i32, %c0_i32_0 : i32, i32
  }
  func.func @transform_14(%arg0: i32) -> (i32, i32) {
    %c0_i32 = arith.constant 0 : i32
    %c0_i32_0 = arith.constant 0 : i32
    %c0_i32_1 = arith.constant 0 : i32
    return %c0_i32, %c0_i32_0 : i32, i32
  }
  func.func @transform_15(%arg0: i32) -> (i32, i32) {
    %c0_i32 = arith.constant 0 : i32
    %c0_i32_0 = arith.constant 0 : i32
    %c0_i32_1 = arith.constant 0 : i32
    return %c0_i32, %c0_i32_0 : i32, i32
  }
  func.func @transform_16(%arg0: i32) -> (i32, i32) {
    %c0_i32 = arith.constant 0 : i32
    %c0_i32_0 = arith.constant 0 : i32
    %c0_i32_1 = arith.constant 0 : i32
    return %c0_i32, %c0_i32_0 : i32, i32
  }
  func.func @transform_17(%arg0: i32) -> (i32, i32) {
    %c0_i32 = arith.constant 0 : i32
    %c0_i32_0 = arith.constant 0 : i32
    %c0_i32_1 = arith.constant 0 : i32
    return %c0_i32, %c0_i32_0 : i32, i32
  }
  func.func @transform_18(%arg0: i32) -> (i32, i32) {
    %c0_i32 = arith.constant 0 : i32
    %c0_i32_0 = arith.constant 0 : i32
    %c0_i32_1 = arith.constant 0 : i32
    return %c0_i32, %c0_i32_0 : i32, i32
  }
  func.func @transform_19(%arg0: i32) -> (i32, i32) {
    %c0_i32 = arith.constant 0 : i32
    %c0_i32_0 = arith.constant 0 : i32
    %c0_i32_1 = arith.constant 0 : i32
    return %c0_i32, %c0_i32_0 : i32, i32
  }
  func.func @transform_20(%arg0: i32) -> (i32, i32) {
    %c0_i32 = arith.constant 0 : i32
    %c0_i32_0 = arith.constant 0 : i32
    %c0_i32_1 = arith.constant 0 : i32
    return %c0_i32, %c0_i32_0 : i32, i32
  }
  func.func @transform_21(%arg0: i32) -> (i32, i32) {
    %c0_i32 = arith.constant 0 : i32
    %c0_i32_0 = arith.constant 0 : i32
    %c0_i32_1 = arith.constant 0 : i32
    return %c0_i32, %c0_i32_0 : i32, i32
  }
}

</mosaic_0001>

<bundles_post_ra>
// kernel: voi_forward.3
= control target key start
LH: loop header
LB: loop body
LE: loop exit
PB: predicated region body
PF: predicated region fallthrough
CT: control target
= control target key end

     0   :  { %s1755_s0 = inlined_call_operand.vmem [shape: f32[2,4,64], index: 0, kind: input, shape index: {}]   ;;  %s1756_s1 = inlined_call_operand.vmem [shape: f32[4,1], index: 1, kind: input, shape index: {}]   ;;  %s1757_s2 = inlined_call_operand.vmem [shape: f32[64,32], index: 2, kind: input, shape index: {}]   ;;  %s1758_s3 = inlined_call_operand.vmem [shape: f32[1,32], index: 3, kind: input, shape index: {}]   ;;  %s1759_s4 = inlined_call_operand.vmem [shape: f32[32,1], index: 4, kind: input, shape index: {}]   ;;  %s1760_s5 = inlined_call_operand.<no memory space> [shape: f32[1,1], index: 5, kind: input, shape index: {}]   ;;  %s1761_s6 = inlined_call_operand.vmem [shape: f32[64,32], index: 6, kind: input, shape index: {}]   ;;  %s1762_s7 = inlined_call_operand.vmem [shape: f32[1,32], index: 7, kind: input, shape index: {}]   ;;  %s1763_s8 = inlined_call_operand.vmem [shape: f32[1,32], index: 8, kind: input, shape index: {}]   ;;  %s1764_s9 = inlined_call_operand.vmem [shape: f32[32,1], index: 9, kind: input, shape index: {}]   ;;  %s1765_s11 = inlined_call_operand.vmem [shape: f32[64,128], index: 11, kind: input, shape index: {}]   ;;  %s1766_s12 = inlined_call_operand.vmem [shape: f32[64,128], index: 12, kind: input, shape index: {}]   ;;  %s1767_s13 = inlined_call_operand.vmem [shape: f32[1,128], index: 13, kind: input, shape index: {}]   ;;  %s1768_s14 = inlined_call_operand.vmem [shape: f32[128,7], index: 14, kind: input, shape index: {}]   ;;  %s1769_s15 = inlined_call_operand.vmem [shape: f32[1,7], index: 15, kind: input, shape index: {}]   ;;  %s1770_s16 = inlined_call_operand.vmem [shape: f32[128,1], index: 16, kind: input, shape index: {}]   ;;  %s1771_s18 = inlined_call_operand.hbm [shape: f32[4,7], index: 18, kind: output, shape index: {0}]   ;;  %s1772_s19 = inlined_call_operand.vmem [shape: f32[4,1], index: 19, kind: output, shape index: {1}]   ;;  %s1773_s20 = inlined_call_operand.vmem [shape: f32[4,1], index: 20, kind: output, shape index: {2}]   ;;  %s1774_s21 = inlined_call_operand.vmem [shape: f32[4,1], index: 21, kind: output, shape index: {3}]   ;;  %s1775_s10 = inlined_call_operand.<no memory space> [shape: f32[1,1], index: 10, kind: input, shape index: {}]   ;;  %s1776_s17 = inlined_call_operand.<no memory space> [shape: f32[1,1], index: 17, kind: input, shape index: {}]  }
   0x1   :  { %1780 = sst [smem:[#allocation8_spill]] %s1755_s0  ;;  %v29_v1 = vstv %s1775_s10  ;;  %v31_v2 = vstv %s1776_s17 }
   0x2   :  { %1781 = sst [smem:[#allocation9_spill]] %s1756_s1  ;;  %30 = vst [vmem:[#allocation3] sm:$0x1] %v29_v1  ;;  %32 = vst [vmem:[#allocation4] sm:$0x1] %v31_v2 }
   0x3   :  { %1782 = sst [smem:[#allocation10_spill]] %s1757_s2 }
   0x4   :  { %1783 = sst [smem:[#allocation11_spill]] %s1758_s3 }
   0x5   :  { %1784 = sst [smem:[#allocation12_spill]] %s1759_s4 }
   0x6   :  { %1785 = sst [smem:[#allocation13_spill]] %s1760_s5 }
   0x7   :  { %s1786_s26 = sld [smem:[#allocation13_spill]] }
   0xd   :  { %v27_v0 = vstv %s1786_s26 }
   0xe   :  { %28 = vst [vmem:[#allocation2] sm:$0x1] %v27_v0 }
   0xf   :  { %s1787_s30 = sld [smem:[#allocation10_spill]]  ;;  %v1290_v6 = vmov 0.0|0.0   ;;  %vm1291_vm0 = vmmov 0   ;;  %v1292_v9 = vmov 0.0   ;;  %s1788_s25 = sld [smem:[#allocation12_spill]] }
  0x10   :  { %1134 = vmatprep.subr.bf16.mxu0 %v1290_v6  ;;  %982 = vmatprep.mubr.msk.f32.mxu0 %vm1291_vm0, %v1292_v9 }
  0x11   :  { %1146 = vmatprep.subr.bf16.mxu1 %v1290_v6  ;;  %993 = vmatprep.mubr.msk.f32.mxu1 %vm1291_vm0, %v1292_v9 }
  0x15   :  { %v72_v3 = vld [vmem:[%s1787_s30] sm:$0xff]  ;;  %v73_v4 = vld [vmem:[%s1787_s30 + $0x8] sm:$0xff]  ;;  %v74_v5 = vld [vmem:[%s1787_s30 + $0x10] sm:$0xff] }
  0x16   :  { %v1135_v7 = vpack.c.bf16 %v73_v4, %v72_v3  ;;  %v75_v8 = vld [vmem:[%s1787_s30 + $0x18] sm:$0xff]  ;;  %v162_v11 = vld [vmem:[%s1788_s25] sm:$0xff]  ;;  %v163_v12 = vld [vmem:[%s1788_s25 + $0x8] sm:$0xff] }
  0x17   :  { %v1138_v10 = vpack.c.bf16 %v75_v8, %v74_v5  ;;  %v76_v13 = vld [vmem:[%s1787_s30 + $0x20] sm:$0xff]  ;;  %v77_v14 = vld [vmem:[%s1787_s30 + $0x28] sm:$0xff]  ;;  %v1147_v15 = vpack.c.bf16 %v163_v12, %v162_v11 }
  0x18   :  { %1136 = vmatpush3.bf16.msra.mxu0 %v1135_v7 }
  0x19   :  { %1137 = vmatprep.subr.bf16.mxu0 %v1290_v6 }
  0x1a   :  { %33 = vsyncpa [#allocation6], 0  ;;  %1148 = vmatpush3.bf16.msra.mxu1 %v1147_v15  ;;  %v1141_v16 = vpack.c.bf16 %v77_v14, %v76_v13  ;;  %v78_v17 = vld [vmem:[%s1787_s30 + $0x30] sm:$0xff]  ;;  %v79_v18 = vld [vmem:[%s1787_s30 + $0x38] sm:$0xff]  ;;  %s1789_s17 = sld [smem:[#allocation8_spill]]  ;;  %vm87_vm1 = vcmask 523264  }
  0x1b   :  { %1149 = vmatprep.subr.bf16.mxu1 %v1290_v6  ;;  %v1144_v19 = vpack.c.bf16 %v79_v18, %v78_v17  ;;  %v164_v21 = vld [vmem:[%s1788_s25 + $0x10] sm:$0xff]  ;;  %v165_v22 = vld [vmem:[%s1788_s25 + $0x18] sm:$0xff]  ;;  %s1790_s28 = sld [smem:[#allocation11_spill]]  ;;  %v258_v25 = vld [vmem:[%s1761_s6] sm:$0xff]  ;;  %vm173_vm2 = vcmask 261120   ;;  %v1293_v42 = vmov 0  }
  0x1c   :  { %1139 = vmatpush3.bf16.msra.mxu0 %v1138_v10  ;;  %v1150_v23 = vpack.c.bf16 %v165_v22, %v164_v21  ;;  %v259_v26 = vld [vmem:[%s1761_s6 + $0x8] sm:$0xff]  ;;  %v260_v32 = vld [vmem:[%s1761_s6 + $0x10] sm:$0xff]  ;;  %v261_v33 = vld [vmem:[%s1761_s6 + $0x18] sm:$0xff]  ;;  %1247 = vset.pattern.permute.xlu0 %v1293_v42  ;;  %s1791_s4 = sld [smem:[#allocation9_spill]]  ;;  %vm840_vm4 = vcmask 3072   ;;  %vm733_vm6 = vcmask 52224  }
  0x1d   :  { %1140 = vmatprep.subr.bf16.mxu0 %v1290_v6  ;;  %v1153_v30 = vpack.c.bf16 %v259_v26, %v258_v25  ;;  %v1156_v34 = vpack.c.bf16 %v261_v33, %v260_v32  ;;  %v262_v35 = vld [vmem:[%s1761_s6 + $0x20] sm:$0xff]  ;;  %v263_v36 = vld [vmem:[%s1761_s6 + $0x28] sm:$0xff]  ;;  %v264_v38 = vld [vmem:[%s1761_s6 + $0x30] sm:$0xff] }
  0x1e   :  { %1151 = vmatpush3.bf16.msra.mxu1 %v1150_v23  ;;  %v1159_v37 = vpack.c.bf16 %v263_v36, %v262_v35  ;;  %v265_v39 = vld [vmem:[%s1761_s6 + $0x38] sm:$0xff]  ;;  %v872_v43 = vld [vmem:[#allocation2] ss:$0 sm:$0xff]  ;;  %v362_v56 = vld [vmem:[%s1764_s9 + $0x8] sm:$0xff] }
  0x1f   :  { %1152 = vmatprep.subr.bf16.mxu1 %v1290_v6  ;;  %v1162_v40 = vpack.c.bf16 %v265_v39, %v264_v38  ;;  %v361_v55 = vld [vmem:[%s1764_s9] sm:$0xff]  ;;  %v363_v61 = vld [vmem:[%s1764_s9 + $0x10] sm:$0xff]  ;;  %v364_v62 = vld [vmem:[%s1764_s9 + $0x18] sm:$0xff] }
  0x20   :  { %1142 = vmatpush3.bf16.msra.mxu0 %v1141_v16  ;;  %v1457_v20 = vld [vmem:[%s1789_s17 + $0x4] sm:$0xf]  ;;  %v1507_v41 = vld [vmem:[%s1789_s17] sm:$0xf]  ;;  %v1165_v58 = vpack.c.bf16 %v362_v56, %v361_v55  ;;  %v1168_v63 = vpack.c.bf16 %v364_v62, %v363_v61  ;;  %v473_v10 = vld [vmem:[%s1765_s11 + $0x8] sm:$0xff] }
  0x21   :  { %1143 = vmatprep.subr.bf16.mxu0 %v1290_v6  ;;  %v870_v24 = vld [vmem:[%s1790_s28] ss:$0 sm:$0xff]  ;;  %v481_v13 = vld [vmem:[%s1766_s12 + $0x8] sm:$0xff]  ;;  %v474_v14 = vld [vmem:[%s1765_s11 + $0x10] sm:$0xff] }
  0x22   :  { %v874_v0 = vld [vmem:[%s1762_s7] ss:$0 sm:$0xff]  ;;  %v475_v15 = vld [vmem:[%s1765_s11 + $0x18] sm:$0xff]  ;;  %v482_v17 = vld [vmem:[%s1766_s12 + $0x10] sm:$0xff] }
  0x23   :  { %v876_v3 = vld [vmem:[%s1763_s8] ss:$0 sm:$0xff]  ;;  %v483_v18 = vld [vmem:[%s1766_s12 + $0x18] sm:$0xff]  ;;  %v477_v23 = vld [vmem:[%s1765_s11 + $0x28] sm:$0xff] }
  0x24   :  { %1145 = vmatpush3.bf16.msra.mxu0 %v1144_v19  ;;  %v472_v8 = vld [vmem:[%s1765_s11] sm:$0xff]  ;;  %v1186_v19 = vpack.c.bf16 %v475_v15, %v474_v14  ;;  %v1174_v21 = vpack.c.bf16 %v483_v18, %v482_v17  ;;  %v485_v25 = vld [vmem:[%s1766_s12 + $0x28] sm:$0xff]  ;;  %v749_v55 = vld [vmem:[%s1770_s16 + $0x18] sm:$0xff] }
  0x25   :  { %1164 = vmatprep.subr.bf16.mxu0 %v1290_v6  ;;  %v480_v11 = vld [vmem:[%s1766_s12] sm:$0xff]  ;;  %v1183_v12 = vpack.c.bf16 %v473_v10, %v472_v8  ;;  %v752_v61 = vld [vmem:[%s1770_s16 + $0x30] sm:$0xff]  ;;  %v753_v62 = vld [vmem:[%s1770_s16 + $0x38] sm:$0xff] }
  0x26   :  { %v1171_v16 = vpack.c.bf16 %v481_v13, %v480_v11  ;;  %v476_v22 = vld [vmem:[%s1765_s11 + $0x20] sm:$0xff]  ;;  %v643_v13 = vld [vmem:[%s1768_s14 + $0x18] sm:$0xff]  ;;  %v645_v15 = vld [vmem:[%s1768_s14 + $0x28] sm:$0xff] }
  0x27   :  { %983 = vmatmul.mubr.msk.f32.vlgmr.msra.gmra.mrb[0].mxu0 %vm87_vm1, %v1457_v20  ;;  %v1189_v26 = vpack.c.bf16 %v477_v23, %v476_v22  ;;  %v877_v35 = vld [vmem:[#allocation3] ss:$0 sm:$0xff]  ;;  %v646_v17 = vld [vmem:[%s1768_s14 + $0x30] sm:$0xff] }
  0x28   :  { %1023 = vmatprep.mubr.msk.f32.mxu0 %vm1291_vm0, %v1292_v9  ;;  %1166 = vmatpush3.bf16.msra.mxu0 %v1165_v58  ;;  %v750_v58 = vld [vmem:[%s1770_s16 + $0x20] sm:$0xff] }
  0x29   :  { %1167 = vmatprep.subr.bf16.mxu0 %v1290_v6  ;;  %v754_v22 = vld [vmem:[%s1770_s16 + $0x40] sm:$0xff] }
  0x2c   :  { %1169 = vmatpush3.bf16.msra.mxu0 %v1168_v63  ;;  %v1228_v63 = vpack.c.bf16 %v753_v62, %v752_v61 }
  0x2d   :  { %1170 = vmatprep.subr.bf16.mxu0 %v1290_v6 }
  0xfa   :  { %v157_v27 = vpop.f32.mrb[0].mxu0 }
  0xfb   :  { %v158_v28 = vadd.f32 %v870_v24, %v157_v27  ;;  %v984_v29 = vpop.f32.mrb[1].mxu0  ;;  %v484_v24 = vld [vmem:[%s1766_s12 + $0x20] sm:$0xff] }
  0xfc   :  { %v1177_v27 = vpack.c.bf16 %v485_v25, %v484_v24  ;;  %v479_v29 = vld [vmem:[%s1765_s11 + $0x38] sm:$0xff]  ;;  %v755_v24 = vld [vmem:[%s1770_s16 + $0x48] sm:$0xff] }
  0xfd   :  { %v161_v31 = vmax.f32 %v158_v28, 0.0  ;;  %v478_v28 = vld [vmem:[%s1765_s11 + $0x30] sm:$0xff]  ;;  %v1231_v25 = vpack.c.bf16 %v755_v24, %v754_v22 }
  0xfe   :  { %v1192_v32 = vpack.c.bf16 %v479_v29, %v478_v28  ;;  %v756_v28 = vld [vmem:[%s1770_s16 + $0x50] sm:$0xff] }
  0xff   :  { %994 = vmatmul.mubr.msk.f32.vlgmr.msra.gmra.mrb[0].mxu1 %vm173_vm2, %v161_v31  ;;  %v487_v31 = vld [vmem:[%s1766_s12 + $0x38] sm:$0xff] }
 0x100   :  { %1154 = vmatpush3.bf16.msra.mxu1 %v1153_v30  ;;  %1012 = vmatprep.mubr.msk.f32.mxu1 %vm1291_vm0, %v1292_v9  ;;  %v486_v30 = vld [vmem:[%s1766_s12 + $0x30] sm:$0xff] }
 0x101   :  { %1155 = vmatprep.subr.bf16.mxu1 %v1290_v6  ;;  %v1180_v33 = vpack.c.bf16 %v487_v31, %v486_v30  ;;  %v757_v30 = vld [vmem:[%s1770_s16 + $0x58] sm:$0xff] }
 0x102   :  { %v1234_v31 = vpack.c.bf16 %v757_v30, %v756_v28 }
 0x104   :  { %1157 = vmatpush3.bf16.msra.mxu1 %v1156_v34  ;;  %v445_v34 = vld [vmem:[%s1791_s4] sm:$0xf] }
 0x105   :  { %1158 = vmatprep.subr.bf16.mxu1 %v1290_v6  ;;  %v446_v36 = vmul.f32 2.0, %v445_v34  ;;  %v758_v34 = vld [vmem:[%s1770_s16 + $0x60] sm:$0xff] }
 0x108   :  { %1160 = vmatpush3.bf16.msra.mxu1 %v1159_v37 }
 0x109   :  { %1161 = vmatprep.subr.bf16.mxu1 %v1290_v6 }
 0x10c   :  { %1163 = vmatpush3.bf16.msra.mxu1 %v1162_v40 }
 0x10d   :  { %1182 = vmatprep.subr.bf16.mxu1 %v1290_v6 }
 0x10f   :  { %1013 = vmatmul.mubr.msk.f32.vlgmr.msra.gmra.mrb[2].mxu1 %vm87_vm1, %v1507_v41 }
 0x110   :  { %1061 = vmatprep.mubr.msk.f32.mxu1 %vm1291_vm0, %v1292_v9  ;;  %1184 = vmatpush3.bf16.msra.mxu1 %v1183_v12  ;;  %v642_v12 = vld [vmem:[%s1768_s14 + $0x10] sm:$0xff] }
 0x111   :  { %1185 = vmatprep.subr.bf16.mxu1 %v1290_v6  ;;  %v1198_v14 = vpack.c.bf16 %v643_v13, %v642_v12 }
 0x114   :  { %1187 = vmatpush3.bf16.msra.mxu1 %v1186_v19  ;;  %v648_v19 = vld [vmem:[%s1768_s14 + $0x40] sm:$0xff] }
 0x115   :  { %1188 = vmatprep.subr.bf16.mxu1 %v1290_v6 }
 0x118   :  { %1190 = vmatpush3.bf16.msra.mxu1 %v1189_v26  ;;  %v650_v26 = vld [vmem:[%s1768_s14 + $0x50] sm:$0xff] }
 0x119   :  { %1191 = vmatprep.subr.bf16.mxu1 %v1290_v6 }
 0x11c   :  { %1193 = vmatpush3.bf16.msra.mxu1 %v1192_v32  ;;  %v652_v32 = vld [vmem:[%s1768_s14 + $0x60] sm:$0xff] }
 0x11d   :  { %1218 = vmatprep.subr.bf16.mxu1 %v1290_v6 }
 0x11f   :  { %1062 = vmatmul.mubr.msk.f32.vlgmr.msra.gmra.mrb[4].mxu1 %vm87_vm1, %v1507_v41 }
 0x120   :  { %1131 = vmatprep.mubr.msk.f32.mxu1 %vm1291_vm0, %v1292_v9 }
 0x1d2   :  { %v243_v44 = vpop.f32.mrb[0].mxu1 }
 0x1d3   :  { %v244_v45 = vadd.f32 %v872_v43, %v243_v44  ;;  %v995_v46 = vpop.f32.mrb[1].mxu1 }
 0x1d5   :  { %v247_v47 = vmul.f32 50.0, %v244_v45 }
 0x1d7   :  { %v249_v48 = vmin.f32 %v247_v47, 20.0  ;;  %vm248_vm3 = vcmp.gt.f32.partialorder %v247_v47, 20.0 }
 0x1d9   :  { %v250_v49 = vmul.f32 1.442695, %v249_v48 }
 0x1db   :  { %1248 = vpow2.f32 %v250_v49  ;;  %v746_v49 = vld [vmem:[%s1770_s16] sm:$0xff] }
 0x1e2   :  { %v348_v59 = vpop.f32.mrb[2].mxu1 }
 0x1e3   :  { %v1014_v60 = vpop.f32.mrb[3].mxu1 }
 0x1e5   :  { %v1249_v50 = vpop.eup %1248 }
 0x1e6   :  { %v252_v51 = vadd.f32 1.0, %v1249_v50  ;;  %v747_v50 = vld [vmem:[%s1770_s16 + $0x8] sm:$0xff] }
 0x1e8   :  { %1250 = vlog2.f32 %v252_v51  ;;  %v1219_v51 = vpack.c.bf16 %v747_v50, %v746_v49  ;;  %v884_v50 = vld [vmem:[%s1769_s15] ss:$0 sm:$0xff]  ;;  %s1294_s15 = smov [#allocation5]  }
 0x1e9   :  { %s850_s11 = sshll.u32 %s1294_s15, 4  ;;  %s851_s11 = int_to_ptr.vmem [resolvable:$true] %s850_s11 }
 0x1ea   :  { %1220 = vmatpush3.bf16.msra.mxu1 %v1219_v51  ;;  %p1271_p1 = scmp.lt.s32.totalorder %s851_s11, %s851_s11 }
 0x1eb   :  { %1221 = vmatprep.subr.bf16.mxu1 %v1290_v6 }
 0x1f2   :  { %v1251_v52 = vpop.eup %1250 }
 0x1f3   :  { %v254_v53 = vmul.f32 0.6931472, %v1251_v52 }
 0x1f5   :  { %v256_v54 = vmul.f32 0.02, %v254_v53 }
 0x1f7   :  { %v1520_v57 = vsel %vm248_vm3, %v244_v45, %v256_v54  ;;  %v748_v54 = vld [vmem:[%s1770_s16 + $0x10] sm:$0xff] }
 0x1f8   :  { %269 = vperm.xlu0 %1247, %v1520_v57   ;;  %v1222_v56 = vpack.c.bf16 %v749_v55, %v748_v54 }
 0x1fa   :  { %1223 = vmatpush3.bf16.msra.mxu1 %v1222_v56 }
 0x1fb   :  { %1224 = vmatprep.subr.bf16.mxu1 %v1290_v6 }
 0x277   :  { %v270_v1 = vpop.permute.xlu0 %269 }
 0x278   :  { %v278_v2 = vmul.f32 %v874_v0, %v270_v1 }
 0x27a   :  { %v349_v4 = vadd.f32 %v348_v59, %v278_v2  ;;  %v751_v59 = vld [vmem:[%s1770_s16 + $0x28] sm:$0xff] }
 0x27b   :  { %v1225_v60 = vpack.c.bf16 %v751_v59, %v750_v58 }
 0x27c   :  { %v359_v5 = vadd.f32 %v876_v3, %v349_v4  ;;  %v1641_v3 = vpop.f32.mrb[4].mxu1 }
 0x27d   :  { %1226 = vmatpush3.bf16.msra.mxu1 %v1225_v60  ;;  %v1063_v4 = vpop.f32.mrb[5].mxu1 }
 0x27e   :  { %v360_v7 = vmax.f32 %v359_v5, 0.0  ;;  %1227 = vmatprep.subr.bf16.mxu1 %v1290_v6  ;;  %v640_v5 = vld [vmem:[%s1768_s14] sm:$0xff] }
 0x280   :  { %1024 = vmatmul.mubr.msk.f32.vlgmr.msra.gmra.mrb[2].mxu0 %vm173_vm2, %v360_v7  ;;  %v641_v7 = vld [vmem:[%s1768_s14 + $0x8] sm:$0xff] }
 0x281   :  { %1042 = vmatprep.mubr.msk.f32.mxu0 %vm1291_vm0, %v1292_v9  ;;  %1172 = vmatpush3.bf16.msra.mxu0 %v1171_v16  ;;  %v1195_v10 = vpack.c.bf16 %v641_v7, %v640_v5 }
 0x282   :  { %1173 = vmatprep.subr.bf16.mxu0 %v1290_v6  ;;  %1229 = vmatpush3.bf16.msra.mxu1 %v1228_v63 }
 0x283   :  { %1230 = vmatprep.subr.bf16.mxu1 %v1290_v6 }
 0x285   :  { %1175 = vmatpush3.bf16.msra.mxu0 %v1174_v21  ;;  %v649_v21 = vld [vmem:[%s1768_s14 + $0x48] sm:$0xff] }
 0x286   :  { %1176 = vmatprep.subr.bf16.mxu0 %v1290_v6  ;;  %v1207_v23 = vpack.c.bf16 %v649_v21, %v648_v19  ;;  %1232 = vmatpush3.bf16.msra.mxu1 %v1231_v25 }
 0x287   :  { %1233 = vmatprep.subr.bf16.mxu1 %v1290_v6 }
 0x289   :  { %1178 = vmatpush3.bf16.msra.mxu0 %v1177_v27  ;;  %v651_v27 = vld [vmem:[%s1768_s14 + $0x58] sm:$0xff] }
 0x28a   :  { %1179 = vmatprep.subr.bf16.mxu0 %v1290_v6  ;;  %v1210_v29 = vpack.c.bf16 %v651_v27, %v650_v26  ;;  %1235 = vmatpush3.bf16.msra.mxu1 %v1234_v31 }
 0x28b   :  { %1236 = vmatprep.subr.bf16.mxu1 %v1290_v6 }
 0x28d   :  { %1181 = vmatpush3.bf16.msra.mxu0 %v1180_v33  ;;  %v653_v33 = vld [vmem:[%s1768_s14 + $0x68] sm:$0xff] }
 0x28e   :  { %1194 = vmatprep.subr.bf16.mxu0 %v1290_v6 }
 0x353   :  { %v441_v37 = vpop.f32.mrb[2].mxu0 }
 0x354   :  { %v442_v38 = vadd.f32 %v877_v35, %v441_v37  ;;  %v1025_v39 = vpop.f32.mrb[3].mxu0  ;;  %v1213_v35 = vpack.c.bf16 %v653_v33, %v652_v32  ;;  %v654_v37 = vld [vmem:[%s1768_s14 + $0x70] sm:$0xff] }
 0x356   :  { %v447_v40 = vadd.f32 %v446_v36, %v442_v38  ;;  %v759_v36 = vld [vmem:[%s1770_s16 + $0x68] sm:$0xff]  ;;  %v655_v38 = vld [vmem:[%s1768_s14 + $0x78] sm:$0xff] }
 0x357   :  { %v1237_v39 = vpack.c.bf16 %v759_v36, %v758_v34 }
 0x358   :  { %v448_v42 = vsub.f32 0.0, %v447_v40  ;;  %v760_v40 = vld [vmem:[%s1770_s16 + $0x70] sm:$0xff] }
 0x359   :  { %1238 = vmatpush3.bf16.msra.mxu1 %v1237_v39 }
 0x35a   :  { %v449_v43 = vmul.f32 1.442695, %v448_v42  ;;  %v761_v42 = vld [vmem:[%s1770_s16 + $0x78] sm:$0xff]  ;;  %1239 = vmatprep.subr.bf16.mxu1 %v1290_v6 }
 0x35c   :  { %1252 = vpow2.f32 %v449_v43  ;;  %v1216_v43 = vpack.c.bf16 %v655_v38, %v654_v37 }
 0x366   :  { %v1253_v44 = vpop.eup %1252 }
 0x367   :  { %v451_v45 = vadd.f32 1.0, %v1253_v44  ;;  %v1240_v44 = vpack.c.bf16 %v761_v42, %v760_v40 }
 0x369   :  { %1254 = vrcp.f32 %v451_v45  ;;  %1241 = vmatpush3.bf16.msra.mxu1 %v1240_v44 }
 0x373   :  { %v1255_v41 = vpop.eup %1254 }
 0x374   :  { %456 = vperm.xlu0 %1247, %v1255_v41   ;;  %v460_v46 = vmul.f32 %v1255_v41, %v1520_v57  ;;  %vm461_vm5 = vcmp.gt.f32.partialorder %v1255_v41, 0.5  ;;  %v883_v41 = vld [vmem:[%s1767_s13] ss:$0 sm:$0xff] }
 0x375   :  { %v879_v47 = vsel %vm461_vm5, 1.0, %v1292_v9 }
 0x376   :  { %v880_v48 = vadd.f32 -0.5, %v879_v47  ;;  %842 = vst.msk [vmem:[%s1773_s20] sm:$0xf] %vm840_vm4, %v460_v46 }
 0x378   :  { %v465_v52 = vmul.f32 40.0, %v880_v48 }
 0x37a   :  { %v466_v53 = vsub.f32 0.0, %v465_v52 }
 0x37c   :  { %v467_v57 = vmul.f32 1.442695, %v466_v53 }
 0x37e   :  { %1256 = vpow2.f32 %v467_v57 }
 0x388   :  { %v1257_v0 = vpop.eup %1256 }
 0x389   :  { %v469_v1 = vadd.f32 1.0, %v1257_v0 }
 0x38b   :  { %1258 = vrcp.f32 %v469_v1 }
 0x395   :  { %v1259_v2 = vpop.eup %1258 }
 0x396   :  { %843 = vst.msk [vmem:[%s1774_s21] sm:$0xf] %vm840_vm4, %v1259_v2 }
 0x3f3   :  { %v457_v8 = vpop.permute.xlu0 %456 }
 0x3f4   :  { %v459_v11 = vmul.f32 %v457_v8, %v1457_v20  ;;  %v644_v20 = vld [vmem:[%s1768_s14 + $0x20] sm:$0xff] }
 0x3f5   :  { %v1201_v16 = vpack.c.bf16 %v645_v15, %v644_v20 }
 0x3f6   :  { %1043 = vmatmul.mubr.msk.f32.vlgmr.msra.gmra.mrb[4].mxu0 %vm87_vm1, %v459_v11 }
 0x3f7   :  { %1196 = vmatpush3.bf16.msra.mxu0 %v1195_v10  ;;  %1096 = vmatprep.mubr.msk.f32.mxu0 %vm1291_vm0, %v1292_v9  ;;  %v647_v9 = vld [vmem:[%s1768_s14 + $0x38] sm:$0xff] }
 0x3f8   :  { %1197 = vmatprep.subr.bf16.mxu0 %v1290_v6  ;;  %v1204_v18 = vpack.c.bf16 %v647_v9, %v646_v17 }
 0x3fb   :  { %1199 = vmatpush3.bf16.msra.mxu0 %v1198_v14 }
 0x3fc   :  { %1200 = vmatprep.subr.bf16.mxu0 %v1290_v6 }
 0x3ff   :  { %1202 = vmatpush3.bf16.msra.mxu0 %v1201_v16 }
 0x400   :  { %1203 = vmatprep.subr.bf16.mxu0 %v1290_v6 }
 0x403   :  { %1205 = vmatpush3.bf16.msra.mxu0 %v1204_v18 }
 0x404   :  { %1206 = vmatprep.subr.bf16.mxu0 %v1290_v6 }
 0x407   :  { %1208 = vmatpush3.bf16.msra.mxu0 %v1207_v23 }
 0x408   :  { %1209 = vmatprep.subr.bf16.mxu0 %v1290_v6 }
 0x40b   :  { %1211 = vmatpush3.bf16.msra.mxu0 %v1210_v29 }
 0x40c   :  { %1212 = vmatprep.subr.bf16.mxu0 %v1290_v6 }
 0x40f   :  { %1214 = vmatpush3.bf16.msra.mxu0 %v1213_v35 }
 0x410   :  { %1215 = vmatprep.subr.bf16.mxu0 %v1290_v6  ;;  %v885_v6 = vld [vmem:[#allocation4] ss:$0 sm:$0xff] }
 0x413   :  { %1217 = vmatpush3.bf16.msra.mxu0 %v1216_v43 }
 0x4c9   :  { %v557_v45 = vpop.f32.mrb[4].mxu0 }
 0x4ca   :  { %v628_v46 = vadd.f32 %v1641_v3, %v557_v45  ;;  %v1044_v47 = vpop.f32.mrb[5].mxu0 }
 0x4cc   :  { %v638_v48 = vadd.f32 %v883_v41, %v628_v46 }
 0x4ce   :  { %1260 = vtanh.f32 %v638_v48 }
 0x4d8   :  { %v1261_v49 = vpop.eup %1260 }
 0x4d9   :  { %1097 = vmatmul.mubr.f32.vlgmr.msra.gmra.mrb[6].mxu0 %v1261_v49  ;;  %1132 = vmatmul.mubr.f32.vlgmr.msra.gmra.mrb[6].mxu1 %v1261_v49 }
 0x5ac   :  { %v729_v51 = vpop.f32.mrb[6].mxu0  ;;  %v835_v52 = vpop.f32.mrb[6].mxu1 }
 0x5ad   :  { %v730_v53 = vadd.f32 %v884_v50, %v729_v51  ;;  %v836_v54 = vadd.f32 %v885_v6, %v835_v52  ;;  %v1098_v55 = vpop.f32.mrb[7].mxu0  ;;  %v1133_v56 = vpop.f32.mrb[7].mxu1 }
 0x5af   :  { %841 = vst.msk [vmem:[%s1772_s19] sm:$0xf] %vm840_vm4, %v836_v54  ;;  %v734_v57 = vsel %vm733_vm6, %v730_v53, -inf  ;;  %s1266_s19 = scalar_lea.vmem %s851_s11, 64 }
 0x5b0   :  { %735 = vmax.xlane.f32.xlu1 %v734_v57  ;;  %p1267_p0 = scmp.ne.s32.totalorder %s851_s11, %s1266_s19  ;;  %p1272_p2 = scmp.lt.s32.totalorder %s1266_s19, %s1266_s19 }
 0x5b2   :  { %p1273_p3 = por %p1272_p2, %p1271_p1 }
 0x5b4   :  { %p1274_p4 = pnand %p1273_p3, %p1267_p0 }
 0x63d   :  { %v736_v58 = vpop.xlane.xlu1 %735 }
 0x63e   :  { %v737_v59 = vsub.f32 %v730_v53, %v736_v58 }
 0x640   :  { %v738_v60 = vmul.f32 1.442695, %v737_v59 }
 0x642   :  { %1262 = vpow2.f32 %v738_v60 }
 0x64c   :  { %v1263_v61 = vpop.eup %1262 }
 0x64d   :  { %v740_v62 = vsel %vm733_vm6, %v1263_v61, 0.0 }
 0x64e   :  { %741 = vadd.xlane.f32.xlu1 %v740_v62 }
 0x6db   :  { %v742_v63 = vpop.xlane.xlu1 %741 }
 0x6dc   :  { %1264 = vlog2.f32 %v742_v63 }
 0x6e6   :  { %v1265_v0 = vpop.eup %1264 }
 0x6e7   :  { %v744_v1 = vmul.f32 0.6931472, %v1265_v0 }
 0x6e9   :  { %v745_v2 = vsub.f32 %v737_v59, %v744_v1 }
 0x6eb   :  { %839 = vst.msk [vmem:[#allocation5] sm:$0xf] %vm733_vm6, %v745_v2 }
 0x6ec   :  { %1277 = shalt.err (!%p1274_p4)
}
 0x6ed   :  { %s1278_s5 = scalar_lea.hbm %s1771_s18, 64 }
 0x6ee   :  { %p1279_p5 = scmp.ne.s32.totalorder %s1771_s18, %s1278_s5  ;;  %p1282_p6 = scmp.lt.u32.totalorder %s1278_s5, %s1771_s18 }
 0x6f0   :  { %p1284_p7 = pnand %p1282_p6, %p1279_p5 }
 0x6f2   :  { %1287 = shalt.err (!%p1284_p7)
}
 0x6f3   :  { %853 = dma.vmem_to_hbm [thread:$0]  %s851_s11, 64, %s1771_s18, [#allocation6]  }
 0x6f4   :  { %1288 = dma.done.wait [#allocation6], 64  }
 0x6f5   :  { %1289 = vsyncadd [#allocation6], 4294967232 }
 0x6f6   :  { %869 = vsyncpa [#allocation6], 1 }

// kernel: voi_forward.2
= control target key start
LH: loop header
LB: loop body
LE: loop exit
PB: predicated region body
PF: predicated region fallthrough
CT: control target
= control target key end

     0   :  { %s3965_s29 = smov 0   ;;  %s4435_s0 = inlined_call_operand.vmem [shape: f32[2,144,12], index: 0, kind: input, shape index: {}]   ;;  %s4436_s1 = inlined_call_operand.vmem [shape: f32[2,12,16], index: 1, kind: input, shape index: {}]   ;;  %s4437_s2 = inlined_call_operand.vmem [shape: f32[2,1,16], index: 2, kind: input, shape index: {}]   ;;  %s4438_s3 = inlined_call_operand.vmem [shape: f32[36,144], index: 3, kind: input, shape index: {}]   ;;  %s4439_s4 = inlined_call_operand.vmem [shape: f32[36,144], index: 4, kind: input, shape index: {}]   ;;  %s4440_s5 = inlined_call_operand.vmem [shape: f32[36,144], index: 5, kind: input, shape index: {}]   ;;  %s4441_s6 = inlined_call_operand.vmem [shape: f32[36,144], index: 6, kind: input, shape index: {}]   ;;  %s4442_s7 = inlined_call_operand.vmem [shape: f32[16,36], index: 7, kind: input, shape index: {}]   ;;  %s4443_s8 = inlined_call_operand.vmem [shape: f32[16,36], index: 8, kind: input, shape index: {}]   ;;  %s4444_s9 = inlined_call_operand.vmem [shape: f32[16,36], index: 9, kind: input, shape index: {}]   ;;  %s4445_s10 = inlined_call_operand.vmem [shape: f32[16,36], index: 10, kind: input, shape index: {}]   ;;  %s4446_s11 = inlined_call_operand.vmem [shape: f32[2,16,32], index: 11, kind: input, shape index: {}]   ;;  %s4447_s12 = inlined_call_operand.vmem [shape: f32[2,16,32], index: 12, kind: input, shape index: {}]   ;;  %s4448_s13 = inlined_call_operand.vmem [shape: f32[2,16,32], index: 13, kind: input, shape index: {}]   ;;  %s4449_s14 = inlined_call_operand.vmem [shape: f32[2,16,32], index: 14, kind: input, shape index: {}]   ;;  %s4450_s15 = inlined_call_operand.vmem [shape: f32[2,1,32], index: 15, kind: input, shape index: {}]   ;;  %s4451_s16 = inlined_call_operand.vmem [shape: f32[4,16], index: 16, kind: input, shape index: {}]   ;;  %s4452_s17 = inlined_call_operand.vmem [shape: f32[4,16], index: 17, kind: input, shape index: {}]   ;;  %s4453_s18 = inlined_call_operand.vmem [shape: f32[4,16], index: 18, kind: input, shape index: {}]   ;;  %s4454_s19 = inlined_call_operand.vmem [shape: f32[4,16], index: 19, kind: input, shape index: {}]   ;;  %s4455_s20 = inlined_call_operand.vmem [shape: f32[2,32,64], index: 20, kind: input, shape index: {}]   ;;  %s4456_s21 = inlined_call_operand.vmem [shape: f32[2,32,64], index: 21, kind: input, shape index: {}]   ;;  %s4457_s22 = inlined_call_operand.vmem [shape: f32[2,32,64], index: 22, kind: input, shape index: {}]   ;;  %s4458_s23 = inlined_call_operand.vmem [shape: f32[2,32,64], index: 23, kind: input, shape index: {}]   ;;  %s4459_s24 = inlined_call_operand.vmem [shape: f32[2,1,64], index: 24, kind: input, shape index: {}]   ;;  %s4460_s25 = inlined_call_operand.vmem [shape: f32[2,4,64], index: 25, kind: output, shape index: {}]  }
   0x1   :  { %4470 = sst [smem:[#allocation2_spill]] %s4435_s0 }
   0x2   :  { %4471 = sst [smem:[#allocation3_spill]] %s4436_s1 }
   0x3   :  { %4472 = sst [smem:[#allocation4_spill]] %s4437_s2 }
   0x4   :  { %4473 = sst [smem:[#allocation5_spill]] %s4438_s3 }
   0x5   :  { %4474 = sst [smem:[#allocation6_spill]] %s4439_s4 }
   0x6   :  { %4475 = sst [smem:[#allocation7_spill]] %s4440_s5 }
   0x7   :  { %4476 = sst [smem:[#allocation8_spill]] %s4441_s6 }
   0x8   :  { %4477 = sst [smem:[#allocation9_spill]] %s4442_s7 }
   0x9   :  { %4478 = sst [smem:[#allocation10_spill]] %s4443_s8 }
   0xa   :  { %4479 = sst [smem:[#allocation11_spill]] %s4444_s9 }
   0xb LB: > { %s3212_s2 = sadd.s32 4294967295, %s3829_s29   ;;  %p3216_p0 = scmp.ge.s32.totalorder %s3829_s29, 1  ;;  %s3829_s29 = sphi %s3965_s29, %s35_s29  }
   0xc   : > { %p801_p1 = scmp.lt.s32.totalorder %s3829_s29, 3 }
   0xe   : > { %p802_p2 = pnand %p3216_p0, %p801_p1 }
   0xf   : > { %p922_p3 = scmp.lt.s32.totalorder (!%p802_p2), %s3212_s2, 1  ;;  %vm1067_vm0 = vcmask (!%p802_p2), 1043456   ;;  %s4480_s26 = sld [smem:[#allocation3_spill]] (!%p802_p2)  ;;  %vm1012_vm1 = vcmask (!%p802_p2), 97280   ;;  %vm3831_vm2 = vmmov (!%p802_p2), 1   ;;  %v3832_v21 = vmov (!%p802_p2), 0.0|0.0  }
  0x10   : > { %805 = sbr.rel (%p802_p2) target bundleno = 1688 (0x698), region = 120  ;;  %s4481_s4 = sld [smem:[#allocation2_spill]] (!%p802_p2)  ;;  %vm3598_vm3 = vmpackc.low (!%p802_p2), %vm1067_vm0, %vm3831_vm2  ;;  %3603 = vmatprep.subr.bf16.mxu1 (!%p802_p2), %v3832_v21  ;;  %vm1254_vm4 = vcmask (!%p802_p2), 130048   ;;  %vm1723_vm5 = vcmask (!%p802_p2), 293888   ;;  %vm3833_vm6 = vmmov (!%p802_p2), 0   ;;  %vm2484_vm7 = vcmask (!%p802_p2), 261120  }
  0x11   : > { %s4482_s0 = sld [smem:[#allocation5_spill]] (!%p802_p2)  ;;  %s4483_s3 = sld [smem:[#allocation6_spill]] (!%p802_p2)  ;;  %vm3022_vm8 = vcmask (!%p802_p2), 519168  }
  0x12   : > { %s4484_s8 = sld [smem:[#allocation4_spill]] (!%p802_p2)  ;;  %s4488_s5 = sld [smem:[#allocation10_spill]] (!%p802_p2) }
  0x17   : > { %s4491_s2 = smov (!%p922_p3, %s3212_s2), 1  ;;  %v1245_v22 = vld [vmem:[%s4482_s0 + $0x8] sm:$0xff] }
  0x18   : > { %s3810_s6 = smul.u32 144, %s4491_s2  ;;  %s3977_s30 = sshll.u32 %s4491_s2, 4  ;;  %3257 = vmatprep.mubr.msk.f32.mxu1 %vm1254_vm4, %v1245_v22  ;;  %v1361_v23 = vld [vmem:[%s4483_s3 + $0x8] sm:$0xff] }
  0x19   : > { %s931_s1 = scalar_lea.vmem %s4480_s26, %s3977_s30  ;;  %s934_s27 = scalar_lea.vmem %s4484_s8, %s4491_s2 }
  0x1a   : > { %s3986_s28 = scalar_lea.vmem %s4481_s4, %s3810_s6  ;;  %v1003_v0 = vld [vmem:[%s931_s1] sm:$0xff]  ;;  %v1004_v1 = vld [vmem:[%s931_s1 + $0x8] sm:$0xf]  ;;  %s4485_s8 = sld [smem:[#allocation7_spill]] }
  0x1b   : > { %v3597_v2 = vpack.c.bf16 %v1004_v1, %v1003_v0  ;;  %v985_v3 = vld [vmem:[%s3986_s28] sm:$0xff]  ;;  %v986_v4 = vld [vmem:[%s3986_s28 + $0x8] sm:$0xff]  ;;  %v987_v5 = vld [vmem:[%s3986_s28 + $0x10] sm:$0xff]  ;;  %s939_s26 = scalar_lea.vmem %s4446_s11, %s3977_s30  ;;  %s944_s7 = scalar_lea.vmem %s4447_s12, %s3977_s30 }
  0x1c   : > { %3418 = vmatprep.mubr.msk.f32.mxu0 %vm1012_vm1, %v985_v3  ;;  %v988_v6 = vld [vmem:[%s3986_s28 + $0x18] sm:$0xff]  ;;  %v989_v7 = vld [vmem:[%s3986_s28 + $0x20] sm:$0xff]  ;;  %v990_v8 = vld [vmem:[%s3986_s28 + $0x28] sm:$0xff]  ;;  %s4489_s6 = sld [smem:[#allocation11_spill]]  ;;  %s949_s1 = scalar_lea.vmem %s4448_s13, %s3977_s30 }
  0x1d   : > { %3599 = vmatprep.subr.msk.bf16.mxu0 %vm3598_vm3, %v3597_v2  ;;  %v991_v9 = vld [vmem:[%s3986_s28 + $0x30] sm:$0xff]  ;;  %v992_v10 = vld [vmem:[%s3986_s28 + $0x38] sm:$0xff]  ;;  %v993_v11 = vld [vmem:[%s3986_s28 + $0x40] sm:$0xff]  ;;  %s3236_s4 = sshll.u32 %s4491_s2, 2 }
  0x1e   : > { %3602 = vmatpush3.bf16.msk.msra.mxu0 %vm3598_vm3, %v3597_v2  ;;  %v994_v12 = vld [vmem:[%s3986_s28 + $0x48] sm:$0xff]  ;;  %v995_v13 = vld [vmem:[%s3986_s28 + $0x50] sm:$0xff]  ;;  %v996_v14 = vld [vmem:[%s3986_s28 + $0x58] sm:$0xff] }
  0x1f   : > { %v997_v15 = vld [vmem:[%s3986_s28 + $0x60] sm:$0xff]  ;;  %v998_v16 = vld [vmem:[%s3986_s28 + $0x68] sm:$0xff]  ;;  %v999_v17 = vld [vmem:[%s3986_s28 + $0x70] sm:$0xff]  ;;  %3630 = vmatprep.subr.bf16.mxu0 %v3832_v21 }
  0x20   : > { %v1000_v18 = vld [vmem:[%s3986_s28 + $0x78] sm:$0xff]  ;;  %v1001_v19 = vld [vmem:[%s3986_s28 + $0x80] sm:$0xff]  ;;  %v1002_v20 = vld [vmem:[%s3986_s28 + $0x88] sm:$0xff]  ;;  %s4486_s28 = sld [smem:[#allocation8_spill]] }
  0x21   : > { %3419 = vmatmul.mubr.msk.f32.vlgmr.msra.gmra.mrb[0].mxu0 %vm1012_vm1, %v986_v4  ;;  %v4039_v24 = vld [vmem:[%s934_s27] ss:$0 sm:$0xff]  ;;  %s4487_s27 = sld [smem:[#allocation9_spill]] }
  0x22   : > { %3421 = vmatprep.mubr.msk.f32.mxu0 %vm1012_vm1, %v987_v5 }
  0x25   : > { %3422 = vmatmul.mubr.msk.f32.gmra.mrb[2].mxu0 %vm1012_vm1, %v988_v6 }
  0x26   : > { %3424 = vmatprep.mubr.msk.f32.mxu0 %vm1012_vm1, %v989_v7 }
  0x29   : > { %3425 = vmatmul.mubr.msk.f32.gmra.mrb[4].mxu0 %vm1012_vm1, %v990_v8 }
  0x2a   : > { %3427 = vmatprep.mubr.msk.f32.mxu0 %vm1012_vm1, %v991_v9 }
  0x2d   : > { %3428 = vmatmul.mubr.msk.f32.gmra.mrb[6].mxu0 %vm1012_vm1, %v992_v10 }
  0x2e   : > { %3430 = vmatprep.mubr.msk.f32.mxu0 %vm1012_vm1, %v993_v11 }
  0x31   : > { %3431 = vmatmul.mubr.msk.f32.gmra.mrb[8].mxu0 %vm1012_vm1, %v994_v12 }
  0x32   : > { %3433 = vmatprep.mubr.msk.f32.mxu0 %vm1012_vm1, %v995_v13 }
  0x35   : > { %3434 = vmatmul.mubr.msk.f32.gmra.mrb[10].mxu0 %vm1012_vm1, %v996_v14 }
  0x36   : > { %3436 = vmatprep.mubr.msk.f32.mxu0 %vm1012_vm1, %v997_v15 }
  0x39   : > { %3437 = vmatmul.mubr.msk.f32.gmra.mrb[12].mxu0 %vm1012_vm1, %v998_v16 }
  0x3a   : > { %3439 = vmatprep.mubr.msk.f32.mxu0 %vm1012_vm1, %v999_v17 }
  0x3d   : > { %3440 = vmatmul.mubr.msk.f32.gmra.mrb[14].mxu0 %vm1012_vm1, %v1000_v18 }
  0x3e   : > { %3442 = vmatprep.mubr.msk.f32.mxu0 %vm1012_vm1, %v1001_v19 }
  0x41   : > { %3443 = vmatmul.mubr.msk.f32.gmra.mrb[16].mxu0 %vm1012_vm1, %v1002_v20 }
  0x42   : > { %3262 = vmatprep.mubr.msk.f32.mxu0 %vm1254_vm4, %v1361_v23 }
  0xf4   : > { %v3420_v25 = vpop.f32.mrb[0].mxu0 }
  0xf5   : > { %v1143_v26 = vadd.f32 %v3420_v25, %v4039_v24  ;;  %v1137_v27 = vpop.f32.mrb[1].mxu0 }
  0xf6   : > { %v1138_v28 = vadd.f32 %v4039_v24, %v1137_v27  ;;  %v1247_v27 = vld [vmem:[%s4482_s0 + $0x18] sm:$0xff] }
  0xf7   : > { %v1227_v29 = vmax.f32 %v1143_v26, 0.0  ;;  %v1360_v26 = vld [vmem:[%s4483_s3] sm:$0xff] }
  0xf8   : > { %v1226_v30 = vmax.f32 %v1138_v28, 0.0  ;;  %v3423_v31 = vpop.f32.mrb[2].mxu0  ;;  %v1363_v28 = vld [vmem:[%s4483_s3 + $0x18] sm:$0xff] }
  0xf9   : > { %v1153_v32 = vadd.f32 %v3423_v31, %v4039_v24  ;;  %v1147_v33 = vpop.f32.mrb[3].mxu0  ;;  %v1249_v31 = vld [vmem:[%s4482_s0 + $0x28] sm:$0xff] }
  0xfa   : > { %v4044_v34 = vpack.c.bf16 %v1227_v29, %v1226_v30  ;;  %v1148_v35 = vadd.f32 %v4039_v24, %v1147_v33  ;;  %v1246_v29 = vld [vmem:[%s4482_s0 + $0x10] sm:$0xff]  ;;  %v1248_v33 = vld [vmem:[%s4482_s0 + $0x20] sm:$0xff] }
  0xfb   : > { %v1229_v36 = vmax.f32 %v1153_v32, 0.0  ;;  %v1362_v30 = vld [vmem:[%s4483_s3 + $0x10] sm:$0xff]  ;;  %v1365_v32 = vld [vmem:[%s4483_s3 + $0x28] sm:$0xff] }
  0xfc   : > { %v1228_v37 = vmax.f32 %v1148_v35, 0.0  ;;  %v3426_v38 = vpop.f32.mrb[4].mxu0  ;;  %3605 = vmatpush1.bf16.msra.mxu1 %v4044_v34  ;;  %3632 = vmatpush1.bf16.msra.mxu0 %v4044_v34  ;;  %v1251_v35 = vld [vmem:[%s4482_s0 + $0x38] sm:$0xff] }
  0xfd   : > { %v1163_v39 = vadd.f32 %v3426_v38, %v4039_v24  ;;  %v1157_v40 = vpop.f32.mrb[5].mxu0  ;;  %3606 = vmatprep.subr.bf16.mxu1 %v3832_v21  ;;  %3633 = vmatprep.subr.bf16.mxu0 %v3832_v21  ;;  %v1366_v38 = vld [vmem:[%s4483_s3 + $0x30] sm:$0xff] }
  0xfe   : > { %v4052_v41 = vpack.c.bf16 %v1229_v36, %v1228_v37  ;;  %v1158_v42 = vadd.f32 %v4039_v24, %v1157_v40  ;;  %v1367_v36 = vld [vmem:[%s4483_s3 + $0x38] sm:$0xff]  ;;  %v1250_v37 = vld [vmem:[%s4482_s0 + $0x30] sm:$0xff]  ;;  %v1369_v40 = vld [vmem:[%s4483_s3 + $0x48] sm:$0xf] }
  0xff   : > { %v1231_v43 = vmax.f32 %v1163_v39, 0.0  ;;  %v1253_v39 = vld [vmem:[%s4482_s0 + $0x48] sm:$0xf] }
 0x100   : > { %v1230_v44 = vmax.f32 %v1158_v42, 0.0  ;;  %v3429_v45 = vpop.f32.mrb[6].mxu0  ;;  %3608 = vmatpush1.bf16.msra.mxu1 %v4052_v41  ;;  %3635 = vmatpush1.bf16.msra.mxu0 %v4052_v41  ;;  %v1368_v42 = vld [vmem:[%s4483_s3 + $0x40] sm:$0xf] }
 0x101   : > { %v1173_v46 = vadd.f32 %v3429_v45, %v4039_v24  ;;  %v1167_v47 = vpop.f32.mrb[7].mxu0  ;;  %3609 = vmatprep.subr.bf16.mxu1 %v3832_v21  ;;  %3636 = vmatprep.subr.bf16.mxu0 %v3832_v21  ;;  %v1480_v45 = vld [vmem:[%s4485_s8] sm:$0xff] }
 0x102   : > { %v4060_v48 = vpack.c.bf16 %v1231_v43, %v1230_v44  ;;  %v1168_v49 = vadd.f32 %v4039_v24, %v1167_v47  ;;  %v1481_v43 = vld [vmem:[%s4485_s8 + $0x8] sm:$0xff]  ;;  %v1483_v47 = vld [vmem:[%s4485_s8 + $0x18] sm:$0xff] }
 0x103   : > { %v1233_v50 = vmax.f32 %v1173_v46, 0.0  ;;  %v1601_v44 = vld [vmem:[%s4486_s28 + $0x8] sm:$0xff]  ;;  %v1600_v46 = vld [vmem:[%s4486_s28] sm:$0xff] }
 0x104   : > { %v1232_v51 = vmax.f32 %v1168_v49, 0.0  ;;  %v3432_v52 = vpop.f32.mrb[8].mxu0  ;;  %3611 = vmatpush1.bf16.msra.mxu1 %v4060_v48  ;;  %3638 = vmatpush1.bf16.msra.mxu0 %v4060_v48  ;;  %v1482_v49 = vld [vmem:[%s4485_s8 + $0x10] sm:$0xff] }
 0x105   : > { %v1183_v53 = vadd.f32 %v3432_v52, %v4039_v24  ;;  %v1177_v54 = vpop.f32.mrb[9].mxu0  ;;  %3612 = vmatprep.subr.bf16.mxu1 %v3832_v21  ;;  %3639 = vmatprep.subr.bf16.mxu0 %v3832_v21  ;;  %v1605_v52 = vld [vmem:[%s4486_s28 + $0x28] sm:$0xff] }
 0x106   : > { %v4068_v55 = vpack.c.bf16 %v1233_v50, %v1232_v51  ;;  %v1178_v56 = vadd.f32 %v4039_v24, %v1177_v54  ;;  %v1602_v50 = vld [vmem:[%s4486_s28 + $0x10] sm:$0xff]  ;;  %v1485_v51 = vld [vmem:[%s4485_s8 + $0x28] sm:$0xff]  ;;  %v1604_v54 = vld [vmem:[%s4486_s28 + $0x20] sm:$0xff] }
 0x107   : > { %v1235_v57 = vmax.f32 %v1183_v53, 0.0  ;;  %v1484_v53 = vld [vmem:[%s4485_s8 + $0x20] sm:$0xff] }
 0x108   : > { %v1234_v58 = vmax.f32 %v1178_v56, 0.0  ;;  %v3435_v59 = vpop.f32.mrb[10].mxu0  ;;  %3614 = vmatpush1.bf16.msra.mxu1 %v4068_v55  ;;  %3641 = vmatpush1.bf16.msra.mxu0 %v4068_v55  ;;  %v1607_v56 = vld [vmem:[%s4486_s28 + $0x38] sm:$0xff] }
 0x109   : > { %v1193_v60 = vadd.f32 %v3435_v59, %v4039_v24  ;;  %v1187_v61 = vpop.f32.mrb[11].mxu0  ;;  %3615 = vmatprep.subr.bf16.mxu1 %v3832_v21  ;;  %3642 = vmatprep.subr.bf16.mxu0 %v3832_v21  ;;  %v1489_v59 = vld [vmem:[%s4485_s8 + $0x48] sm:$0xf] }
 0x10a   : > { %v4076_v62 = vpack.c.bf16 %v1235_v57, %v1234_v58  ;;  %v1188_v63 = vadd.f32 %v4039_v24, %v1187_v61  ;;  %v1486_v57 = vld [vmem:[%s4485_s8 + $0x30] sm:$0xff]  ;;  %v1488_v61 = vld [vmem:[%s4485_s8 + $0x40] sm:$0xf] }
 0x10b   : > { %v1237_v0 = vmax.f32 %v1193_v60, 0.0  ;;  %v1606_v58 = vld [vmem:[%s4486_s28 + $0x30] sm:$0xff]  ;;  %v1609_v60 = vld [vmem:[%s4486_s28 + $0x48] sm:$0xf] }
 0x10c   : > { %v1236_v1 = vmax.f32 %v1188_v63, 0.0  ;;  %v3438_v2 = vpop.f32.mrb[12].mxu0  ;;  %3617 = vmatpush1.bf16.msra.mxu1 %v4076_v62  ;;  %3644 = vmatpush1.bf16.msra.mxu0 %v4076_v62  ;;  %v1721_v63 = vld [vmem:[%s4487_s27] sm:$0xff] }
 0x10d   : > { %v1203_v3 = vadd.f32 %v3438_v2, %v4039_v24  ;;  %v1197_v4 = vpop.f32.mrb[13].mxu0  ;;  %3618 = vmatprep.subr.bf16.mxu1 %v3832_v21  ;;  %3645 = vmatprep.subr.bf16.mxu0 %v3832_v21 }
 0x10e   : > { %v4084_v5 = vpack.c.bf16 %v1237_v0, %v1236_v1  ;;  %v1198_v6 = vadd.f32 %v4039_v24, %v1197_v4  ;;  %v1899_v0 = vld [vmem:[%s4488_s5] sm:$0xff] }
 0x10f   : > { %v1239_v7 = vmax.f32 %v1203_v3, 0.0 }
 0x110   : > { %v1238_v8 = vmax.f32 %v1198_v6, 0.0  ;;  %v3441_v9 = vpop.f32.mrb[14].mxu0  ;;  %3620 = vmatpush1.bf16.msra.mxu1 %v4084_v5  ;;  %3647 = vmatpush1.bf16.msra.mxu0 %v4084_v5 }
 0x111   : > { %v1213_v10 = vadd.f32 %v3441_v9, %v4039_v24  ;;  %v1207_v11 = vpop.f32.mrb[15].mxu0  ;;  %3621 = vmatprep.subr.bf16.mxu1 %v3832_v21  ;;  %3648 = vmatprep.subr.bf16.mxu0 %v3832_v21 }
 0x112   : > { %v4092_v12 = vpack.c.bf16 %v1239_v7, %v1238_v8  ;;  %v1208_v13 = vadd.f32 %v4039_v24, %v1207_v11 }
 0x113   : > { %v1241_v14 = vmax.f32 %v1213_v10, 0.0 }
 0x114   : > { %v1240_v15 = vmax.f32 %v1208_v13, 0.0  ;;  %v3444_v16 = vpop.f32.mrb[16].mxu0  ;;  %3623 = vmatpush1.bf16.msra.mxu1 %v4092_v12  ;;  %3650 = vmatpush1.bf16.msra.mxu0 %v4092_v12 }
 0x115   : > { %v1223_v17 = vadd.f32 %v3444_v16, %v4039_v24  ;;  %v1217_v18 = vpop.f32.mrb[17].mxu0  ;;  %3624 = vmatprep.subr.bf16.mxu1 %v3832_v21  ;;  %3651 = vmatprep.subr.bf16.mxu0 %v3832_v21 }
 0x116   : > { %v4100_v19 = vpack.c.bf16 %v1241_v14, %v1240_v15  ;;  %v1218_v20 = vadd.f32 %v4039_v24, %v1217_v18  ;;  %v1244_v24 = vld [vmem:[%s4482_s0] sm:$0xff] }
 0x117   : > { %v1243_v22 = vmax.f32 %v1223_v17, 0.0 }
 0x118   : > { %v1242_v23 = vmax.f32 %v1218_v20, 0.0  ;;  %3626 = vmatpush1.bf16.msra.mxu1 %v4100_v19  ;;  %3653 = vmatpush1.bf16.msra.mxu0 %v4100_v19 }
 0x119   : > { %3627 = vmatprep.subr.bf16.mxu1 %v3832_v21  ;;  %3654 = vmatprep.subr.bf16.mxu0 %v3832_v21 }
 0x11a   : > { %v4107_v25 = vpack.c.bf16 %v1243_v22, %v1242_v23 }
 0x11c   : > { %3629 = vmatpush1.bf16.msra.mxu1 %v4107_v25  ;;  %3656 = vmatpush1.bf16.msra.mxu0 %v4107_v25 }
 0x11d   : > { %3657 = vmatprep.subr.bf16.mxu1 %v3832_v21  ;;  %3684 = vmatprep.subr.bf16.mxu0 %v3832_v21 }
 0x11f   : > { %1335 = vmatmul.mubr.f32.vlgmr.msra.gmra.mrb[0].mxu1 %v1244_v24  ;;  %1450 = vmatmul.mubr.f32.vlgmr.msra.gmra.mrb[18].mxu0 %v1360_v26 }
 0x120   : > { %3659 = vmatpush1.bf16.msra.mxu1 %v4044_v34  ;;  %3686 = vmatpush1.bf16.msra.mxu0 %v4044_v34  ;;  %v1364_v34 = vld [vmem:[%s4483_s3 + $0x20] sm:$0xff]  ;;  %s980_s3 = scalar_lea.vmem %s4459_s24, %s4491_s2 }
 0x121   : > { %3660 = vmatprep.subr.bf16.mxu1 %v3832_v21  ;;  %3687 = vmatprep.subr.bf16.mxu0 %v3832_v21 }
 0x122   : > { %3258 = vmatprep.mubr.msk.f32.mxu1 %vm1254_vm4, %v1247_v27  ;;  %3263 = vmatprep.mubr.msk.f32.mxu0 %vm1254_vm4, %v1363_v28 }
 0x123   : > { %1340 = vmatmul.mubr.f32.gmra.mrb[2].mxu1 %v1246_v29  ;;  %1455 = vmatmul.mubr.f32.gmra.mrb[20].mxu0 %v1362_v30 }
 0x124   : > { %3662 = vmatpush1.bf16.msra.mxu1 %v4052_v41  ;;  %3689 = vmatpush1.bf16.msra.mxu0 %v4052_v41  ;;  %v1252_v41 = vld [vmem:[%s4482_s0 + $0x40] sm:$0xf]  ;;  %s4364_s0 = sshll.u32 %s4491_s2, 5 }
 0x125   : > { %3663 = vmatprep.subr.bf16.mxu1 %v3832_v21  ;;  %3690 = vmatprep.subr.bf16.mxu0 %v3832_v21  ;;  %s962_s9 = scalar_lea.vmem %s4455_s20, %s4364_s0 }
 0x126   : > { %3259 = vmatprep.mubr.msk.f32.mxu1 %vm1254_vm4, %v1249_v31  ;;  %3264 = vmatprep.mubr.msk.f32.mxu0 %vm1254_vm4, %v1365_v32 }
 0x127   : > { %1345 = vmatmul.mubr.f32.gmra.mrb[4].mxu1 %v1248_v33  ;;  %1460 = vmatmul.mubr.f32.gmra.mrb[22].mxu0 %v1364_v34 }
 0x128   : > { %3665 = vmatpush1.bf16.msra.mxu1 %v4060_v48  ;;  %3692 = vmatpush1.bf16.msra.mxu0 %v4060_v48  ;;  %v1603_v48 = vld [vmem:[%s4486_s28 + $0x18] sm:$0xff] }
 0x129   : > { %3666 = vmatprep.subr.bf16.mxu1 %v3832_v21  ;;  %3693 = vmatprep.subr.bf16.mxu0 %v3832_v21 }
 0x12a   : > { %3260 = vmatprep.mubr.msk.f32.mxu1 %vm1254_vm4, %v1251_v35  ;;  %3265 = vmatprep.mubr.msk.f32.mxu0 %vm1254_vm4, %v1367_v36 }
 0x12b   : > { %1350 = vmatmul.mubr.f32.gmra.mrb[6].mxu1 %v1250_v37  ;;  %1465 = vmatmul.mubr.f32.gmra.mrb[24].mxu0 %v1366_v38 }
 0x12c   : > { %3668 = vmatpush1.bf16.msra.mxu1 %v4068_v55  ;;  %3695 = vmatpush1.bf16.msra.mxu0 %v4068_v55  ;;  %v1487_v55 = vld [vmem:[%s4485_s8 + $0x38] sm:$0xff] }
 0x12d   : > { %3669 = vmatprep.subr.bf16.mxu1 %v3832_v21  ;;  %3696 = vmatprep.subr.bf16.mxu0 %v3832_v21 }
 0x12e   : > { %3261 = vmatprep.mubr.msk.f32.mxu1 %vm1254_vm4, %v1253_v39  ;;  %3266 = vmatprep.mubr.msk.f32.mxu0 %vm1254_vm4, %v1369_v40 }
 0x12f   : > { %1355 = vmatmul.mubr.f32.gmra.mrb[8].mxu1 %v1252_v41  ;;  %1470 = vmatmul.mubr.f32.gmra.mrb[26].mxu0 %v1368_v42 }
 0x130   : > { %3671 = vmatpush1.bf16.msra.mxu1 %v4076_v62  ;;  %3698 = vmatpush1.bf16.msra.mxu0 %v4076_v62  ;;  %v1608_v62 = vld [vmem:[%s4486_s28 + $0x40] sm:$0xf] }
 0x131   : > { %3672 = vmatprep.subr.bf16.mxu1 %v3832_v21  ;;  %3699 = vmatprep.subr.bf16.mxu0 %v3832_v21 }
 0x132   : > { %3267 = vmatprep.mubr.msk.f32.mxu1 %vm1254_vm4, %v1481_v43  ;;  %3272 = vmatprep.mubr.msk.f32.mxu0 %vm1254_vm4, %v1601_v44 }
 0x134   : > { %3674 = vmatpush1.bf16.msra.mxu1 %v4084_v5  ;;  %3701 = vmatpush1.bf16.msra.mxu0 %v4084_v5 }
 0x135   : > { %3675 = vmatprep.subr.bf16.mxu1 %v3832_v21  ;;  %3702 = vmatprep.subr.bf16.mxu0 %v3832_v21 }
 0x138   : > { %3677 = vmatpush1.bf16.msra.mxu1 %v4092_v12  ;;  %3704 = vmatpush1.bf16.msra.mxu0 %v4092_v12 }
 0x139   : > { %3678 = vmatprep.subr.bf16.mxu1 %v3832_v21  ;;  %3705 = vmatprep.subr.bf16.mxu0 %v3832_v21 }
 0x13c   : > { %3680 = vmatpush1.bf16.msra.mxu1 %v4100_v19  ;;  %3707 = vmatpush1.bf16.msra.mxu0 %v4100_v19 }
 0x13d   : > { %3681 = vmatprep.subr.bf16.mxu1 %v3832_v21  ;;  %3708 = vmatprep.subr.bf16.mxu0 %v3832_v21 }
 0x140   : > { %3683 = vmatpush1.bf16.msra.mxu1 %v4107_v25  ;;  %3710 = vmatpush1.bf16.msra.mxu0 %v4107_v25 }
 0x143   : > { %1570 = vmatmul.mubr.f32.vlgmr.msra.gmra.mrb[10].mxu1 %v1480_v45  ;;  %1690 = vmatmul.mubr.f32.vlgmr.msra.gmra.mrb[28].mxu0 %v1600_v46 }
 0x144   : > { %3268 = vmatprep.mubr.msk.f32.mxu1 %vm1254_vm4, %v1483_v47  ;;  %3273 = vmatprep.mubr.msk.f32.mxu0 %vm1254_vm4, %v1603_v48 }
 0x147   : > { %1575 = vmatmul.mubr.f32.gmra.mrb[12].mxu1 %v1482_v49  ;;  %1695 = vmatmul.mubr.f32.gmra.mrb[30].mxu0 %v1602_v50 }
 0x148   : > { %3269 = vmatprep.mubr.msk.f32.mxu1 %vm1254_vm4, %v1485_v51  ;;  %3274 = vmatprep.mubr.msk.f32.mxu0 %vm1254_vm4, %v1605_v52 }
 0x14b   : > { %1580 = vmatmul.mubr.f32.gmra.mrb[14].mxu1 %v1484_v53  ;;  %1700 = vmatmul.mubr.f32.gmra.mrb[32].mxu0 %v1604_v54 }
 0x14c   : > { %3270 = vmatprep.mubr.msk.f32.mxu1 %vm1254_vm4, %v1487_v55  ;;  %3275 = vmatprep.mubr.msk.f32.mxu0 %vm1254_vm4, %v1607_v56 }
 0x14f   : > { %1585 = vmatmul.mubr.f32.gmra.mrb[16].mxu1 %v1486_v57  ;;  %1705 = vmatmul.mubr.f32.gmra.mrb[34].mxu0 %v1606_v58 }
 0x150   : > { %3271 = vmatprep.mubr.msk.f32.mxu1 %vm1254_vm4, %v1489_v59  ;;  %3276 = vmatprep.mubr.msk.f32.mxu0 %vm1254_vm4, %v1609_v60  ;;  %v1808_v59 = vld [vmem:[%s939_s26] sm:$0xff]  ;;  %v1809_v60 = vld [vmem:[%s939_s26 + $0x8] sm:$0xff]  ;;  %s977_s26 = scalar_lea.vmem %s4458_s23, %s4364_s0 }
 0x153   : > { %1590 = vmatmul.mubr.f32.gmra.mrb[18].mxu1 %v1488_v61  ;;  %1710 = vmatmul.mubr.f32.gmra.mrb[36].mxu0 %v1608_v62  ;;  %v1722_v61 = vld [vmem:[%s4487_s27 + $0x8] sm:$0xff]  ;;  %v3719_v62 = vpack.c.bf16 %v1809_v60, %v1808_v59 }
 0x154   : > { %3455 = vmatprep.mubr.msk.f32.mxu0 %vm1723_vm5, %v1721_v63  ;;  %3475 = vmatprep.mubr.msk.f32.mxu1 %vm1723_vm5, %v1899_v0  ;;  %v1900_v63 = vld [vmem:[%s4488_s5 + $0x8] sm:$0xff]  ;;  %v1982_v0 = vld [vmem:[%s944_s7] sm:$0xff] }
 0x1f2   : > { %v1336_v1 = vpop.f32.mrb[0].mxu1  ;;  %v1451_v2 = vpop.f32.mrb[18].mxu0 }
 0x1f3   : > { %v1338_v3 = vpop.f32.mrb[1].mxu1  ;;  %v1475_v4 = vmax.f32 %v1336_v1, %v1451_v2  ;;  %v1453_v5 = vpop.f32.mrb[19].mxu0  ;;  %v1983_v1 = vld [vmem:[%s944_s7 + $0x8] sm:$0xff]  ;;  %s954_s7 = scalar_lea.vmem %s4449_s14, %s3977_s30  ;;  %s984_s30 = scalar_lea.vmem %s4460_s25, %s3236_s4 }
 0x1f4   : > { %v3731_v2 = vpack.c.bf16 %v1983_v1, %v1982_v0  ;;  %v2235_v3 = vld [vmem:[%s4445_s10] sm:$0xff]  ;;  %v2945_v0 = vld [vmem:[%s977_s26 + $0x10] sm:$0xff]  ;;  %v2946_v1 = vld [vmem:[%s977_s26 + $0x18] sm:$0xff] }
 0x1f6   : > { %v1341_v6 = vpop.f32.mrb[2].mxu1  ;;  %v1456_v7 = vpop.f32.mrb[20].mxu0 }
 0x1f7   : > { %v1343_v8 = vpop.f32.mrb[3].mxu1  ;;  %v1476_v9 = vmax.f32 %v1341_v6, %v1456_v7  ;;  %v1458_v10 = vpop.f32.mrb[21].mxu0 }
 0x1f8   : > { %v2150_v10 = vld [vmem:[%s949_s1] sm:$0xff] }
 0x1fa   : > { %v1346_v11 = vpop.f32.mrb[4].mxu1  ;;  %v1461_v12 = vpop.f32.mrb[22].mxu0 }
 0x1fb   : > { %v1348_v13 = vpop.f32.mrb[5].mxu1  ;;  %v1477_v14 = vmax.f32 %v1346_v11, %v1461_v12  ;;  %v1463_v15 = vpop.f32.mrb[23].mxu0  ;;  %v2151_v11 = vld [vmem:[%s949_s1 + $0x8] sm:$0xff]  ;;  %s957_s1 = scalar_lea.vmem %s4450_s15, %s4491_s2 }
 0x1fc   : > { %v3743_v12 = vpack.c.bf16 %v2151_v11, %v2150_v10  ;;  %v2068_v13 = vld [vmem:[%s4489_s6 + $0x8] sm:$0xff]  ;;  %v2318_v15 = vld [vmem:[%s954_s7] sm:$0xff] }
 0x1fe   : > { %v1351_v16 = vpop.f32.mrb[6].mxu1  ;;  %v1466_v17 = vpop.f32.mrb[24].mxu0 }
 0x1ff   : > { %v1353_v18 = vpop.f32.mrb[7].mxu1  ;;  %v1478_v19 = vmax.f32 %v1351_v16, %v1466_v17  ;;  %v1468_v20 = vpop.f32.mrb[25].mxu0  ;;  %v2319_v16 = vld [vmem:[%s954_s7 + $0x8] sm:$0xff] }
 0x200   : > { %v3755_v18 = vpack.c.bf16 %v2319_v16, %v2318_v15 }
 0x202   : > { %v1356_v22 = vpop.f32.mrb[8].mxu1  ;;  %v1471_v23 = vpop.f32.mrb[26].mxu0 }
 0x203   : > { %v1358_v25 = vpop.f32.mrb[9].mxu1  ;;  %v1479_v24 = vmax.f32 %v1356_v22, %v1471_v23  ;;  %v1473_v26 = vpop.f32.mrb[27].mxu0  ;;  %v3834_v22 = vmov 0.0   ;;  %v3282_v23 = vld [vmem:[%s957_s1] ss:$0 sm:$0xff]  ;;  %s967_s1 = scalar_lea.vmem %s4456_s21, %s4364_s0 }
 0x216   : > { %v1571_v27 = vpop.f32.mrb[10].mxu1  ;;  %v1691_v28 = vpop.f32.mrb[28].mxu0 }
 0x217   : > { %v1595_v29 = vmax.f32 %v1475_v4, %v1571_v27  ;;  %v1573_v30 = vpop.f32.mrb[11].mxu1  ;;  %v1693_v31 = vpop.f32.mrb[29].mxu0  ;;  %v2236_v4 = vld [vmem:[%s4445_s10 + $0x8] sm:$0xff] }
 0x218   : > { %v2480_v31 = vld [vmem:[%s962_s9] sm:$0xff] }
 0x219   : > { %v1715_v32 = vmax.f32 %v1595_v29, %v1691_v28 }
 0x21a   : > { %v1576_v33 = vpop.f32.mrb[12].mxu1  ;;  %v1696_v34 = vpop.f32.mrb[30].mxu0 }
 0x21b   : > { %v1596_v35 = vmax.f32 %v1476_v9, %v1576_v33  ;;  %v1578_v36 = vpop.f32.mrb[13].mxu1  ;;  %v1698_v37 = vpop.f32.mrb[31].mxu0  ;;  %v2067_v9 = vld [vmem:[%s4489_s6] sm:$0xff] }
 0x21c   : > { %v2406_v33 = vld [vmem:[%s4451_s16] sm:$0xf]  ;;  %v2482_v36 = vld [vmem:[%s962_s9 + $0x10] sm:$0xff]  ;;  %v2483_v37 = vld [vmem:[%s962_s9 + $0x18] sm:$0xff] }
 0x21d   : > { %v1716_v38 = vmax.f32 %v1596_v35, %v1696_v34  ;;  %v2565_v34 = vld [vmem:[%s4452_s17] sm:$0xf] }
 0x21e   : > { %v1581_v39 = vpop.f32.mrb[14].mxu1  ;;  %v1701_v40 = vpop.f32.mrb[32].mxu0 }
 0x21f   : > { %v4287_v41 = vpack.c.bf16 %v1716_v38, %v1715_v32  ;;  %v1597_v42 = vmax.f32 %v1477_v14, %v1581_v39  ;;  %v1583_v43 = vpop.f32.mrb[15].mxu1  ;;  %v1703_v44 = vpop.f32.mrb[33].mxu0  ;;  %v2481_v32 = vld [vmem:[%s962_s9 + $0x8] sm:$0xff]  ;;  %v2717_v38 = vld [vmem:[%s4453_s18] sm:$0xf]  ;;  %v3766_v39 = vpack.c.bf16 %v2483_v37, %v2482_v36  ;;  %s972_s9 = scalar_lea.vmem %s4457_s22, %s4364_s0 }
 0x220   : > { %v3763_v35 = vpack.c.bf16 %v2481_v32, %v2480_v31  ;;  %v2641_v44 = vld [vmem:[%s967_s1 + $0x10] sm:$0xff] }
 0x221   : > { %v1717_v45 = vmax.f32 %v1597_v42, %v1701_v40  ;;  %3712 = vmatprep.subr.bf16.mxu0 %v4287_v41  ;;  %3724 = vmatprep.subr.bf16.mxu1 %v4287_v41  ;;  %v2869_v40 = vld [vmem:[%s4454_s19] sm:$0xf]  ;;  %v2640_v42 = vld [vmem:[%s967_s1 + $0x8] sm:$0xff] }
 0x222   : > { %v1586_v46 = vpop.f32.mrb[16].mxu1  ;;  %3714 = vmatpush3.bf16.msra.mxu0 %v4287_v41  ;;  %3726 = vmatpush3.bf16.msra.mxu1 %v4287_v41  ;;  %v1706_v47 = vpop.f32.mrb[34].mxu0 }
 0x223   : > { %v1598_v48 = vmax.f32 %v1478_v19, %v1586_v46  ;;  %v1588_v49 = vpop.f32.mrb[17].mxu1  ;;  %v1708_v50 = vpop.f32.mrb[35].mxu0 }
 0x225   : > { %v1718_v51 = vmax.f32 %v1598_v48, %v1706_v47 }
 0x226   : > { %v1591_v52 = vpop.f32.mrb[18].mxu1  ;;  %v1711_v53 = vpop.f32.mrb[36].mxu0 }
 0x227   : > { %v3715_v54 = vpack.c.bf16 %v1718_v51, %v1717_v45  ;;  %v1599_v55 = vmax.f32 %v1479_v24, %v1591_v52  ;;  %v1593_v56 = vpop.f32.mrb[19].mxu1  ;;  %v1713_v57 = vpop.f32.mrb[37].mxu0  ;;  %v2642_v45 = vld [vmem:[%s967_s1 + $0x18] sm:$0xff]  ;;  %v2791_v51 = vld [vmem:[%s972_s9] sm:$0xff]  ;;  %v2792_v52 = vld [vmem:[%s972_s9 + $0x8] sm:$0xff] }
 0x228   : > { %v3775_v50 = vpack.c.bf16 %v2642_v45, %v2641_v44  ;;  %v2793_v56 = vld [vmem:[%s972_s9 + $0x10] sm:$0xff]  ;;  %v2794_v57 = vld [vmem:[%s972_s9 + $0x18] sm:$0xff] }
 0x229   : > { %v1719_v58 = vmax.f32 %v1599_v55, %v1711_v53  ;;  %3716 = vmatprep.subr.bf16.mxu0 %v3715_v54  ;;  %3728 = vmatprep.subr.bf16.mxu1 %v3715_v54  ;;  %v3781_v55 = vpack.c.bf16 %v2792_v52, %v2791_v51  ;;  %v3784_v60 = vpack.c.bf16 %v2794_v57, %v2793_v56 }
 0x22a   : > { %3718 = vmatpush3.bf16.msra.mxu0 %v3715_v54  ;;  %3730 = vmatpush3.bf16.msra.mxu1 %v3715_v54 }
 0x22b   : > { %3453 = vmatprep.subr.msk.mxu0 %vm1067_vm0, %v1719_v58  ;;  %3473 = vmatprep.subr.msk.mxu1 %vm1067_vm0, %v1719_v58 }
 0x22e   : > { %3454 = vmatpush3.msk.msra.mxu0 %vm1067_vm0, %v1719_v58  ;;  %3474 = vmatpush3.msk.msra.mxu1 %vm1067_vm0, %v1719_v58 }
 0x22f   : > { %3456 = vmatmul.mubr.msk.f32.vlgmr.msra.gmra.mrb[38].mxu0 %vm1723_vm5, %v1722_v61  ;;  %3748 = vmatprep.subr.bf16.mxu1 %v4287_v41  ;;  %v2943_v61 = vld [vmem:[%s977_s26] sm:$0xff] }
 0x230   : > { %3476 = vmatmul.mubr.msk.f32.vlgmr.msra.gmra.mrb[20].mxu1 %vm1723_vm5, %v1900_v63  ;;  %3720 = vmatprep.subr.bf16.mxu0 %v3719_v62 }
 0x231   : > { %3750 = vmatpush3.bf16.msra.mxu1 %v4287_v41  ;;  %3722 = vmatpush3.bf16.msra.mxu0 %v3719_v62  ;;  %v2944_v62 = vld [vmem:[%s977_s26 + $0x8] sm:$0xff] }
 0x232   : > { %3752 = vmatprep.subr.bf16.mxu1 %v3715_v54  ;;  %3732 = vmatprep.subr.bf16.mxu0 %v3731_v2  ;;  %v3790_v63 = vpack.c.bf16 %v2944_v62, %v2943_v61 }
 0x233   : > { %3515 = vmatprep.mubr.msk.f32.mxu1 %vm1723_vm5, %v2235_v3  ;;  %v3300_v3 = vld [vmem:[%s980_s3] ss:$0 sm:$0xff] }
 0x235   : > { %3754 = vmatpush3.bf16.msra.mxu1 %v3715_v54 }
 0x236   : > { %3513 = vmatprep.subr.msk.mxu1 %vm1067_vm0, %v1719_v58 }
 0x239   : > { %3514 = vmatpush3.msk.msra.mxu1 %vm1067_vm0, %v1719_v58 }
 0x23a   : > { %3759 = vmatprep.subr.bf16.mxu1 %v3832_v21  ;;  %3516 = vmatmul.mubr.msk.f32.vlgmr.msra.gmra.mrb[22].mxu1 %vm1723_vm5, %v2236_v4 }
 0x23b   : > { %3529 = vmatprep.mubr.msk.f32.mxu1 %vm3833_vm6, %v3834_v22 }
 0x302   : > { %v3457_v5 = vpop.f32.mrb[38].mxu0 }
 0x303   : > { %v1799_v6 = vpop.f32.mrb[39].mxu0  ;;  %v3477_v7 = vpop.f32.mrb[20].mxu1 }
 0x304   : > { %3462 = vmatprep.mubr.msk.f32.mxu0 %vm1254_vm4, %v1799_v6  ;;  %v1973_v8 = vpop.f32.mrb[21].mxu1 }
 0x305   : > { %3463 = vmatmul.mubr.msk.f32.vlgmr.msra.gmra.mrb[40].mxu0 %vm1254_vm4, %v3457_v5 }
 0x306   : > { %3734 = vmatpush3.bf16.msra.mxu0 %v3731_v2  ;;  %3482 = vmatprep.mubr.msk.f32.mxu0 %vm1254_vm4, %v1973_v8  ;;  %v3793_v2 = vpack.c.bf16 %v2946_v1, %v2945_v0 }
 0x307   : > { %3736 = vmatprep.subr.bf16.mxu0 %v4287_v41 }
 0x30d   : > { %3483 = vmatmul.mubr.msk.f32.vlgmr.msra.gmra.mrb[40].mxu0 %vm1254_vm4, %v3477_v7  ;;  %v3517_v14 = vpop.f32.mrb[22].mxu1 }
 0x30e   : > { %3738 = vmatpush3.bf16.msra.mxu0 %v4287_v41  ;;  %3495 = vmatprep.mubr.msk.f32.mxu0 %vm1723_vm5, %v2067_v9  ;;  %v2309_v17 = vpop.f32.mrb[23].mxu1  ;;  %v2639_v41 = vld [vmem:[%s967_s1] sm:$0xff] }
 0x30f   : > { %3740 = vmatprep.subr.bf16.mxu0 %v3715_v54  ;;  %v3772_v43 = vpack.c.bf16 %v2640_v42, %v2639_v41 }
 0x312   : > { %3742 = vmatpush3.bf16.msra.mxu0 %v3715_v54 }
 0x313   : > { %3493 = vmatprep.subr.msk.mxu0 %vm1067_vm0, %v1719_v58 }
 0x316   : > { %3494 = vmatpush3.msk.msra.mxu0 %vm1067_vm0, %v1719_v58 }
 0x317   : > { %3496 = vmatmul.mubr.msk.f32.vlgmr.msra.gmra.mrb[42].mxu0 %vm1723_vm5, %v2068_v13  ;;  %3744 = vmatprep.subr.bf16.mxu0 %v3743_v12 }
 0x318   : > { %3746 = vmatpush3.bf16.msra.mxu0 %v3743_v12 }
 0x319   : > { %3756 = vmatprep.subr.bf16.mxu0 %v3755_v18 }
 0x3ea   : > { %v3497_v19 = vpop.f32.mrb[42].mxu0 }
 0x3eb   : > { %v2141_v20 = vpop.f32.mrb[43].mxu0 }
 0x3ec   : > { %3502 = vmatprep.mubr.msk.f32.mxu0 %vm1254_vm4, %v2141_v20 }
 0x3ed   : > { %3503 = vmatmul.mubr.msk.f32.vlgmr.msra.gmra.mrb[40].mxu0 %vm1254_vm4, %v3497_v19 }
 0x3ee   : > { %3758 = vmatpush3.bf16.msra.mxu0 %v3755_v18  ;;  %3522 = vmatprep.mubr.msk.f32.mxu0 %vm1254_vm4, %v2309_v17 }
 0x3ef   : > { %3768 = vmatprep.subr.bf16.mxu0 %v3832_v21 }
 0x3f5   : > { %3523 = vmatmul.mubr.msk.f32.vlgmr.msra.gmra.mrb[40].mxu0 %vm1254_vm4, %v3517_v14 }
 0x3f6   : > { %3547 = vmatprep.mubr.msk.f32.mxu0 %vm3833_vm6, %v3834_v22 }
 0x4c8   : > { %v3524_v25 = vpop.f32.mrb[40].mxu0 }
 0x4c9   : > { %v3795_v24 = vadd.f32 %v3524_v25, %v3282_v23  ;;  %v2392_v26 = vpop.f32.mrb[41].mxu0 }
 0x4ca   : > { %v3796_v27 = vadd.f32 %v3282_v23, %v2392_v26 }
 0x4cb   : > { %v2404_v28 = vmax.f32 %v3795_v24, 0.0 }
 0x4cc   : > { %v2403_v29 = vmax.f32 %v3796_v27, 0.0 }
 0x4ce   : > { %v3760_v30 = vpack.c.bf16 %v2404_v28, %v2403_v29 }
 0x4d0   : > { %3761 = vmatpush3.bf16.msra.mxu1 %v3760_v30  ;;  %3770 = vmatpush3.bf16.msra.mxu0 %v3760_v30 }
 0x4d1   : > { %3777 = vmatprep.subr.bf16.mxu0 %v3832_v21  ;;  %3762 = vmatprep.subr.bf16.mxu1 %v3832_v21 }
 0x4d3   : > { %3530 = vmatmul.mubr.msk.f32.vlgmr.msra.gmra.mrb[24].mxu1 %vm1254_vm4, %v2406_v33  ;;  %3548 = vmatmul.mubr.msk.f32.vlgmr.msra.gmra.mrb[44].mxu0 %vm1254_vm4, %v2565_v34 }
 0x4d4   : > { %3779 = vmatpush3.bf16.msra.mxu0 %v3760_v30  ;;  %3565 = vmatprep.mubr.msk.f32.mxu0 %vm3833_vm6, %v3834_v22 }
 0x4d5   : > { %3786 = vmatprep.subr.bf16.mxu0 %v3832_v21  ;;  %3764 = vmatpush3.bf16.msra.mxu1 %v3763_v35 }
 0x4d6   : > { %3765 = vmatprep.subr.bf16.mxu1 %v3832_v21  ;;  %3540 = vmatprep.mubr.msk.f32.mxu1 %vm3833_vm6, %v3834_v22 }
 0x4d7   : > { %3566 = vmatmul.mubr.msk.f32.vlgmr.msra.gmra.mrb[46].mxu0 %vm1254_vm4, %v2717_v38 }
 0x4d8   : > { %3788 = vmatpush3.bf16.msra.mxu0 %v3760_v30  ;;  %3583 = vmatprep.mubr.msk.f32.mxu0 %vm3833_vm6, %v3834_v22 }
 0x4d9   : > { %3767 = vmatpush3.bf16.msra.mxu1 %v3766_v39 }
 0x4da   : > { %3771 = vmatprep.subr.bf16.mxu1 %v3832_v21 }
 0x4db   : > { %3584 = vmatmul.mubr.msk.f32.vlgmr.msra.gmra.mrb[48].mxu0 %vm1254_vm4, %v2869_v40 }
 0x5a6   : > { %v2476_v46 = vpop.f32.mrb[24].mxu1  ;;  %v2635_v47 = vpop.f32.mrb[44].mxu0 }
 0x5a7   : > { %3541 = vmatmul.mubr.msk.f32.vlgmr.msra.gmra.mrb[26].mxu1 %vm2484_vm7, %v2476_v46  ;;  %v3531_v48 = vpop.f32.mrb[25].mxu1  ;;  %v3549_v49 = vpop.f32.mrb[45].mxu0 }
 0x5a8   : > { %3773 = vmatpush3.bf16.msra.mxu1 %v3772_v43  ;;  %3558 = vmatprep.mubr.msk.f32.mxu1 %vm3833_vm6, %v3834_v22 }
 0x5a9   : > { %3774 = vmatprep.subr.bf16.mxu1 %v3832_v21 }
 0x5aa   : > { %v2787_v53 = vpop.f32.mrb[46].mxu0 }
 0x5ab   : > { %v3567_v54 = vpop.f32.mrb[47].mxu0 }
 0x5ac   : > { %3776 = vmatpush3.bf16.msra.mxu1 %v3775_v50 }
 0x5ad   : > { %3780 = vmatprep.subr.bf16.mxu1 %v3832_v21 }
 0x5ae   : > { %v2939_v58 = vpop.f32.mrb[48].mxu0 }
 0x5af   : > { %3559 = vmatmul.mubr.msk.f32.vlgmr.msra.gmra.mrb[26].mxu1 %vm2484_vm7, %v2635_v47  ;;  %v3585_v59 = vpop.f32.mrb[49].mxu0 }
 0x5b0   : > { %3782 = vmatpush3.bf16.msra.mxu1 %v3781_v55  ;;  %3576 = vmatprep.mubr.msk.f32.mxu1 %vm3833_vm6, %v3834_v22 }
 0x5b1   : > { %3783 = vmatprep.subr.bf16.mxu1 %v3832_v21 }
 0x5b4   : > { %3785 = vmatpush3.bf16.msra.mxu1 %v3784_v60 }
 0x5b5   : > { %3789 = vmatprep.subr.bf16.mxu1 %v3832_v21 }
 0x5b7   : > { %3577 = vmatmul.mubr.msk.f32.vlgmr.msra.gmra.mrb[26].mxu1 %vm2484_vm7, %v2787_v53 }
 0x5b8   : > { %3791 = vmatpush3.bf16.msra.mxu1 %v3790_v63  ;;  %3594 = vmatprep.mubr.msk.f32.mxu1 %vm3833_vm6, %v3834_v22 }
 0x5b9   : > { %3792 = vmatprep.subr.bf16.mxu1 %v3832_v21 }
 0x5bc   : > { %3794 = vmatpush3.bf16.msra.mxu1 %v3793_v2 }
 0x5bf   : > { %3595 = vmatmul.mubr.msk.f32.vlgmr.msra.gmra.mrb[26].mxu1 %vm2484_vm7, %v2939_v58 }
 0x692   : > { %v3016_v4 = vpop.f32.mrb[26].mxu1 }
 0x693   : > { %v3797_v5 = vadd.f32 %v3300_v3, %v3016_v4  ;;  %v3596_v6 = vpop.f32.mrb[27].mxu1 }
 0x695   : > { %v3021_v7 = vmax.f32 %v3797_v5, 0.0 }
 0x697   : > { %3023 = vst.msk [vmem:[%s984_s30] sm:$0xf] %vm3022_vm8, %v3021_v7 }
 0x698 PF: > { %s35_s29 = sadd.s32 1, %s3829_s29  }
 0x699   : > { %p32_p4 = scmp.ge.s32.totalorder %s35_s29, 4  }
 0x69b   :  { %34 = sbr.rel (!%p32_p4) target bundleno = 11 (0xb), region = 186 }

</bundles_post_ra>
